<compile_context>
chip_gen: v6e
topology: v6e:2x2x1
jax: 0.10.0
libtpu: 0.0.40
codegen_flags: <defaults>
</compile_context>

<pallas_src>
import functools

import jax
import jax.numpy as jnp
from jax.experimental import pallas as pl
from jax.experimental.pallas import tpu as pltpu

IN_SIZE = 2
HIDDEN = 128
OUT_SIZE = 3
PAD_OUT = 128  # lane-dense padded output width


def mlp_kernel(x_ref, w1_ref, b1_ref, w2_ref, b2_ref, w3_ref, b3_ref,
               w4_ref, b4_ref, o_ref):
    # Layer 1 (K=2) on the VPU: two broadcast fma-style ops instead of an MXU
    # matmul that would use only 2 of 128/256 rows of the systolic array.
    x = x_ref[...]                                    # (tile_n, 2)
    h = (x[:, 0:1] * w1_ref[0:1, :]
         + x[:, 1:2] * w1_ref[1:2, :]
         + b1_ref[...])                               # (tile_n, 128)
    h = jnp.maximum(h, 0.0)

    # Layer 2: (tile_n, 128) @ (128, 128) + (1, 128), ReLU  (MXU)
    h = jnp.dot(h, w2_ref[...], preferred_element_type=jnp.float32)
    h = jnp.maximum(h + b2_ref[...], 0.0)

    # Layer 3: (tile_n, 128) @ (128, 128) + (1, 128), ReLU  (MXU)
    h = jnp.dot(h, w3_ref[...], preferred_element_type=jnp.float32)
    h = jnp.maximum(h + b3_ref[...], 0.0)

    # Layer 4: padded to 128 output columns -> full-width MXU matmul and a
    # lane-dense (tile_n, 128) store; real outputs live in columns [0, 3).
    y = jnp.dot(h, w4_ref[...], preferred_element_type=jnp.float32)
    y = y + b4_ref[...]
    o_ref[...] = jax.nn.sigmoid(y).astype(o_ref.dtype)


@functools.partial(jax.jit, static_argnames=("tile_n",))
def simple_model_forward(x, params, *, tile_n=512):
    """x: (N, IN_SIZE) float32.  Returns (N, OUT_SIZE) float32."""
    w1, b1, w2, b2, w3, b3, w4, b4 = params
    n, in_size = x.shape

    # Zero-pad layer-4 params to a lane-dense 128-wide output.
    w4p = jnp.zeros((HIDDEN, PAD_OUT), jnp.float32).at[:, :OUT_SIZE].set(w4)
    b4p = jnp.zeros((1, PAD_OUT), jnp.float32).at[:, :OUT_SIZE].set(b4)

    # Pad the batch so it tiles evenly by tile_n.
    n_pad = ((n + tile_n - 1) // tile_n) * tile_n
    if n_pad != n:
        x = jnp.pad(x, ((0, n_pad - n), (0, 0)))
    grid = (n_pad // tile_n,)

    # Weights/biases are small: constant block index -> resident in VMEM for
    # the whole grid (no re-DMA per step).
    def rep2(i):
        return (0, 0)

    in_specs = [
        pl.BlockSpec((tile_n, in_size), lambda i: (i, 0)),   # x tile
        pl.BlockSpec((IN_SIZE, HIDDEN), rep2),               # w1
        pl.BlockSpec((1, HIDDEN), rep2),                     # b1
        pl.BlockSpec((HIDDEN, HIDDEN), rep2),                # w2
        pl.BlockSpec((1, HIDDEN), rep2),                     # b2
        pl.BlockSpec((HIDDEN, HIDDEN), rep2),                # w3
        pl.BlockSpec((1, HIDDEN), rep2),                     # b3
        pl.BlockSpec((HIDDEN, PAD_OUT), rep2),               # w4 (padded)
        pl.BlockSpec((1, PAD_OUT), rep2),                    # b4 (padded)
    ]
    out_spec = pl.BlockSpec((tile_n, PAD_OUT), lambda i: (i, 0))

    out_padded = pl.pallas_call(
        mlp_kernel,
        out_shape=jax.ShapeDtypeStruct((n_pad, PAD_OUT), jnp.float32),
        grid_spec=pl.GridSpec(
            grid=grid,
            in_specs=in_specs,
            out_specs=out_spec,
        ),
        compiler_params=pltpu.CompilerParams(
            dimension_semantics=("parallel",)),
    )(x, w1, b1, w2, b2, w3, b3, w4p, b4p)

    # Strip batch padding and the zero-padded output lanes.
    return out_padded[:n, :OUT_SIZE]


def init_params(key):
    """PyTorch nn.Linear-style init: U(-1/sqrt(fan_in), 1/sqrt(fan_in)).

    Weights are stored transposed relative to PyTorch, i.e. (fan_in, fan_out),
    so each layer is x @ W + b.
    """
    sizes = [(IN_SIZE, HIDDEN), (HIDDEN, HIDDEN), (HIDDEN, HIDDEN),
             (HIDDEN, OUT_SIZE)]
    params = []
    for fan_in, fan_out in sizes:
        key, kw, kb = jax.random.split(key, 3)
        bound = 1.0 / jnp.sqrt(jnp.float32(fan_in))
        w = jax.random.uniform(kw, (fan_in, fan_out), jnp.float32,
                               -bound, bound)
        b = jax.random.uniform(kb, (1, fan_out), jnp.float32, -bound, bound)
        params += [w, b]
    return tuple(params)


def reference_forward(x, params):
    w1, b1, w2, b2, w3, b3, w4, b4 = params
    # Layer 1 (fan_in=2) written elementwise in exact f32 — mathematically
    # identical to x @ w1 + b1 and matches the kernel's VPU formulation.
    h = jax.nn.relu(x[:, 0:1] * w1[0:1, :] + x[:, 1:2] * w1[1:2, :] + b1)
    h = jax.nn.relu(h @ w2 + b2)
    h = jax.nn.relu(h @ w3 + b3)
    return jax.nn.sigmoid(h @ w4 + b4)


if __name__ == "__main__":
    key = jax.random.PRNGKey(0)
    kx, kp = jax.random.split(key)

    # Batch of 2D coordinates (e.g. normalized pixel positions in [-1, 1]).
    # N=1024 with tile_n=512 -> 2 parallel grid steps (feeds both v7x TCs).
    N = 1024
    x = jax.random.uniform(kx, (N, IN_SIZE), jnp.float32, -1.0, 1.0)
    params = init_params(kp)

    out = simple_model_forward(x, params, tile_n=512)
    out = jax.block_until_ready(out)

    ref = reference_forward(x, params)
    assert out.shape == (N, OUT_SIZE)
    assert jnp.allclose(out, ref, atol=1e-5, rtol=1e-5), "mismatch vs reference"

    print("KERNEL_OK")
</pallas_src>

<mosaic_0001>
module attributes {stable_mosaic.version = 11 : i64} {
  func.func @mlp_kernel(%arg0: i32, %arg1: memref<512x2xf32, #tpu.memory_space<vmem>>, %arg2: memref<2x128xf32, #tpu.memory_space<vmem>>, %arg3: memref<1x128xf32, #tpu.memory_space<vmem>>, %arg4: memref<128x128xf32, #tpu.memory_space<vmem>>, %arg5: memref<1x128xf32, #tpu.memory_space<vmem>>, %arg6: memref<128x128xf32, #tpu.memory_space<vmem>>, %arg7: memref<1x128xf32, #tpu.memory_space<vmem>>, %arg8: memref<128x128xf32, #tpu.memory_space<vmem>>, %arg9: memref<1x128xf32, #tpu.memory_space<vmem>>, %arg10: memref<512x128xf32, #tpu.memory_space<vmem>>) attributes {dimension_semantics = [#tpu.dimension_semantics<parallel>], iteration_bounds = array<i64: 2>, scalar_prefetch = 0 : i64, scratch_operands = 0 : i64, tpu.core_type = #tpu.core_type<tc>, window_params = [{transform_indices = @transform_0, window_bounds = array<i64: 512, 2>}, {pipeline_mode = #tpu.pipeline_mode<synchronous>, transform_indices = @transform_1, window_bounds = array<i64: 2, 128>}, {pipeline_mode = #tpu.pipeline_mode<synchronous>, transform_indices = @transform_2, window_bounds = array<i64: 1, 128>}, {pipeline_mode = #tpu.pipeline_mode<synchronous>, transform_indices = @transform_3, window_bounds = array<i64: 128, 128>}, {pipeline_mode = #tpu.pipeline_mode<synchronous>, transform_indices = @transform_4, window_bounds = array<i64: 1, 128>}, {pipeline_mode = #tpu.pipeline_mode<synchronous>, transform_indices = @transform_5, window_bounds = array<i64: 128, 128>}, {pipeline_mode = #tpu.pipeline_mode<synchronous>, transform_indices = @transform_6, window_bounds = array<i64: 1, 128>}, {pipeline_mode = #tpu.pipeline_mode<synchronous>, transform_indices = @transform_7, window_bounds = array<i64: 128, 128>}, {pipeline_mode = #tpu.pipeline_mode<synchronous>, transform_indices = @transform_8, window_bounds = array<i64: 1, 128>}, {transform_indices = @transform_9, window_bounds = array<i64: 512, 128>}]} {
    %c0 = arith.constant 0 : index
    %c0_0 = arith.constant 0 : index
    %0 = vector.load %arg1[%c0, %c0_0] : memref<512x2xf32, #tpu.memory_space<vmem>>, vector<512x2xf32>
    %1 = vector.extract_strided_slice %0 {offsets = [0, 0], sizes = [512, 1], strides = [1, 1]} : vector<512x2xf32> to vector<512x1xf32>
    %c0_1 = arith.constant 0 : index
    %c0_2 = arith.constant 0 : index
    %2 = vector.load %arg2[%c0_1, %c0_2] : memref<2x128xf32, #tpu.memory_space<vmem>>, vector<1x128xf32>
    %3 = vector.broadcast %1 : vector<512x1xf32> to vector<512x128xf32>
    %4 = vector.broadcast %2 : vector<1x128xf32> to vector<512x128xf32>
    %5 = arith.mulf %3, %4 : vector<512x128xf32>
    %6 = vector.extract_strided_slice %0 {offsets = [0, 1], sizes = [512, 1], strides = [1, 1]} : vector<512x2xf32> to vector<512x1xf32>
    %c1 = arith.constant 1 : index
    %c0_3 = arith.constant 0 : index
    %7 = vector.load %arg2[%c1, %c0_3] : memref<2x128xf32, #tpu.memory_space<vmem>>, vector<1x128xf32>
    %8 = vector.broadcast %6 : vector<512x1xf32> to vector<512x128xf32>
    %9 = vector.broadcast %7 : vector<1x128xf32> to vector<512x128xf32>
    %10 = arith.mulf %8, %9 : vector<512x128xf32>
    %11 = arith.addf %5, %10 : vector<512x128xf32>
    %c0_4 = arith.constant 0 : index
    %c0_5 = arith.constant 0 : index
    %12 = vector.load %arg3[%c0_4, %c0_5] : memref<1x128xf32, #tpu.memory_space<vmem>>, vector<1x128xf32>
    %13 = vector.broadcast %12 : vector<1x128xf32> to vector<512x128xf32>
    %14 = arith.addf %11, %13 : vector<512x128xf32>
    %cst = arith.constant 0.000000e+00 : f32
    %15 = vector.broadcast %cst : f32 to vector<512x128xf32>
    %16 = arith.maximumf %14, %15 : vector<512x128xf32>
    %c0_6 = arith.constant 0 : index
    %c0_7 = arith.constant 0 : index
    %17 = vector.load %arg4[%c0_6, %c0_7] : memref<128x128xf32, #tpu.memory_space<vmem>>, vector<128x128xf32>
    %cst_8 = arith.constant dense<0.000000e+00> : vector<512x128xf32>
    %18 = tpu.matmul %16, %17, %cst_8 {dimension_numbers = #tpu.dot_dimension_numbers<[1], [0], [0], [1], [0, 0, 1, 1], [], []>} : vector<512x128xf32>, vector<128x128xf32>, vector<512x128xf32> -> vector<512x128xf32>
    %c0_9 = arith.constant 0 : index
    %c0_10 = arith.constant 0 : index
    %19 = vector.load %arg5[%c0_9, %c0_10] : memref<1x128xf32, #tpu.memory_space<vmem>>, vector<1x128xf32>
    %20 = vector.broadcast %19 : vector<1x128xf32> to vector<512x128xf32>
    %21 = arith.addf %18, %20 : vector<512x128xf32>
    %cst_11 = arith.constant 0.000000e+00 : f32
    %22 = vector.broadcast %cst_11 : f32 to vector<512x128xf32>
    %23 = arith.maximumf %21, %22 : vector<512x128xf32>
    %c0_12 = arith.constant 0 : index
    %c0_13 = arith.constant 0 : index
    %24 = vector.load %arg6[%c0_12, %c0_13] : memref<128x128xf32, #tpu.memory_space<vmem>>, vector<128x128xf32>
    %cst_14 = arith.constant dense<0.000000e+00> : vector<512x128xf32>
    %25 = tpu.matmul %23, %24, %cst_14 {dimension_numbers = #tpu.dot_dimension_numbers<[1], [0], [0], [1], [0, 0, 1, 1], [], []>} : vector<512x128xf32>, vector<128x128xf32>, vector<512x128xf32> -> vector<512x128xf32>
    %c0_15 = arith.constant 0 : index
    %c0_16 = arith.constant 0 : index
    %26 = vector.load %arg7[%c0_15, %c0_16] : memref<1x128xf32, #tpu.memory_space<vmem>>, vector<1x128xf32>
    %27 = vector.broadcast %26 : vector<1x128xf32> to vector<512x128xf32>
    %28 = arith.addf %25, %27 : vector<512x128xf32>
    %cst_17 = arith.constant 0.000000e+00 : f32
    %29 = vector.broadcast %cst_17 : f32 to vector<512x128xf32>
    %30 = arith.maximumf %28, %29 : vector<512x128xf32>
    %c0_18 = arith.constant 0 : index
    %c0_19 = arith.constant 0 : index
    %31 = vector.load %arg8[%c0_18, %c0_19] : memref<128x128xf32, #tpu.memory_space<vmem>>, vector<128x128xf32>
    %cst_20 = arith.constant dense<0.000000e+00> : vector<512x128xf32>
    %32 = tpu.matmul %30, %31, %cst_20 {dimension_numbers = #tpu.dot_dimension_numbers<[1], [0], [0], [1], [0, 0, 1, 1], [], []>} : vector<512x128xf32>, vector<128x128xf32>, vector<512x128xf32> -> vector<512x128xf32>
    %c0_21 = arith.constant 0 : index
    %c0_22 = arith.constant 0 : index
    %33 = vector.load %arg9[%c0_21, %c0_22] : memref<1x128xf32, #tpu.memory_space<vmem>>, vector<1x128xf32>
    %34 = vector.broadcast %33 : vector<1x128xf32> to vector<512x128xf32>
    %35 = arith.addf %32, %34 : vector<512x128xf32>
    %36 = arith.negf %35 : vector<512x128xf32>
    %37 = math.exp %36 : vector<512x128xf32>
    %cst_23 = arith.constant 1.000000e+00 : f32
    %38 = vector.broadcast %cst_23 : f32 to vector<512x128xf32>
    %39 = arith.addf %38, %37 : vector<512x128xf32>
    %40 = arith.divf %38, %39 : vector<512x128xf32>
    %c0_24 = arith.constant 0 : index
    %c0_25 = arith.constant 0 : index
    %41 = vector.load %arg10[%c0_24, %c0_25] : memref<512x128xf32, #tpu.memory_space<vmem>>, vector<512x128xf32>
    tpu.vector_store %arg10[%c0_24, %c0_25], %40 {strides = array<i32>} : memref<512x128xf32, #tpu.memory_space<vmem>>, vector<512x128xf32>,
    return
  }
  func.func @transform_0(%arg0: i32) -> (i32, i32) {
    %c0_i32 = arith.constant 0 : i32
    %c0_i32_0 = arith.constant 0 : i32
    return %arg0, %c0_i32 : i32, i32
  }
  func.func @transform_1(%arg0: i32) -> (i32, i32) {
    %c0_i32 = arith.constant 0 : i32
    %c0_i32_0 = arith.constant 0 : i32
    %c0_i32_1 = arith.constant 0 : i32
    return %c0_i32, %c0_i32_0 : i32, i32
  }
  func.func @transform_2(%arg0: i32) -> (i32, i32) {
    %c0_i32 = arith.constant 0 : i32
    %c0_i32_0 = arith.constant 0 : i32
    %c0_i32_1 = arith.constant 0 : i32
    return %c0_i32, %c0_i32_0 : i32, i32
  }
  func.func @transform_3(%arg0: i32) -> (i32, i32) {
    %c0_i32 = arith.constant 0 : i32
    %c0_i32_0 = arith.constant 0 : i32
    %c0_i32_1 = arith.constant 0 : i32
    return %c0_i32, %c0_i32_0 : i32, i32
  }
  func.func @transform_4(%arg0: i32) -> (i32, i32) {
    %c0_i32 = arith.constant 0 : i32
    %c0_i32_0 = arith.constant 0 : i32
    %c0_i32_1 = arith.constant 0 : i32
    return %c0_i32, %c0_i32_0 : i32, i32
  }
  func.func @transform_5(%arg0: i32) -> (i32, i32) {
    %c0_i32 = arith.constant 0 : i32
    %c0_i32_0 = arith.constant 0 : i32
    %c0_i32_1 = arith.constant 0 : i32
    return %c0_i32, %c0_i32_0 : i32, i32
  }
  func.func @transform_6(%arg0: i32) -> (i32, i32) {
    %c0_i32 = arith.constant 0 : i32
    %c0_i32_0 = arith.constant 0 : i32
    %c0_i32_1 = arith.constant 0 : i32
    return %c0_i32, %c0_i32_0 : i32, i32
  }
  func.func @transform_7(%arg0: i32) -> (i32, i32) {
    %c0_i32 = arith.constant 0 : i32
    %c0_i32_0 = arith.constant 0 : i32
    %c0_i32_1 = arith.constant 0 : i32
    return %c0_i32, %c0_i32_0 : i32, i32
  }
  func.func @transform_8(%arg0: i32) -> (i32, i32) {
    %c0_i32 = arith.constant 0 : i32
    %c0_i32_0 = arith.constant 0 : i32
    %c0_i32_1 = arith.constant 0 : i32
    return %c0_i32, %c0_i32_0 : i32, i32
  }
  func.func @transform_9(%arg0: i32) -> (i32, i32) {
    %c0_i32 = arith.constant 0 : i32
    %c0_i32_0 = arith.constant 0 : i32
    return %arg0, %c0_i32 : i32, i32
  }
}

</mosaic_0001>

<bundles_post_ra>
// kernel: simple_model_forward.1
= control target key start
LH: loop header
LB: loop body
LE: loop exit
PB: predicated region body
PF: predicated region fallthrough
CT: control target
= control target key end

     0   :  { %s4241_s30 = smov 0   ;;  %s4979_s0 = inlined_call_operand.vmem [shape: f32[1024,2], index: 0, kind: input, shape index: {}]   ;;  %s4980_s1 = inlined_call_operand.vmem [shape: f32[2,128], index: 1, kind: input, shape index: {}]   ;;  %s4981_s2 = inlined_call_operand.vmem [shape: f32[1,128], index: 2, kind: input, shape index: {}]   ;;  %s4982_s3 = inlined_call_operand.vmem [shape: f32[128,128], index: 3, kind: input, shape index: {}]   ;;  %s4983_s4 = inlined_call_operand.vmem [shape: f32[1,128], index: 4, kind: input, shape index: {}]   ;;  %s4984_s5 = inlined_call_operand.vmem [shape: f32[128,128], index: 5, kind: input, shape index: {}]   ;;  %s4985_s6 = inlined_call_operand.vmem [shape: f32[1,128], index: 6, kind: input, shape index: {}]   ;;  %s4986_s7 = inlined_call_operand.vmem [shape: f32[128,128], index: 7, kind: input, shape index: {}]   ;;  %s4987_s8 = inlined_call_operand.vmem [shape: f32[1,128], index: 8, kind: input, shape index: {}]   ;;  %s4988_s9 = inlined_call_operand.vmem [shape: f32[1024,128], index: 9, kind: output, shape index: {}]  }
   0x1 LB: > { %s3169_s10 = sadd.s32 4294967295, %s4187_s30   ;;  %p3173_p0 = scmp.ge.s32.totalorder %s4187_s30, 1  ;;  %s4187_s30 = sphi %s4241_s30, %s19_s30  }
   0x2   : > { %p288_p1 = scmp.lt.s32.totalorder %s4187_s30, 3 }
   0x4   : > { %p289_p2 = pnand %p3173_p0, %p288_p1 }
   0x5   : > { %s3174_s11 = sshll.u32 (!%p289_p2), %s3169_s10, 6 }
   0x6   : > { %292 = sbr.rel (%p289_p2) target bundleno = 1035 (0x40b), region = 56  ;;  %p325_p3 = scmp.lt.s32.totalorder (!%p289_p2), %s3174_s11, 127 }
   0xb   : > { %v1328_v0 = vld [vmem:[%s4982_s3 + $0x78] sm:$0xff]  ;;  %v4189_v1 = vmov 0   ;;  %v1327_v2 = vld [vmem:[%s4982_s3 + $0x70] sm:$0xff]  ;;  %s4990_s11 = smov (!%p325_p3, %s3174_s11), 127  ;;  %v1326_v3 = vld [vmem:[%s4982_s3 + $0x68] sm:$0xff]  ;;  %v4190_v8 = vmov 1  }
   0xc   : > { %3918 = vset.pattern.permute.xlu1 %v4189_v1  ;;  %3916 = vset.pattern.permute.xlu0 %v4189_v1  ;;  %s3175_s18 = sshll.u32 %s4990_s11, 3  ;;  %v1325_v4 = vld [vmem:[%s4982_s3 + $0x60] sm:$0xff]  ;;  %v1324_v7 = vld [vmem:[%s4982_s3 + $0x58] sm:$0xff]  ;;  %v1323_v9 = vld [vmem:[%s4982_s3 + $0x50] sm:$0xff] }
   0xd   : > { %3490 = vmatprep.subr.mxu0 %v1328_v0  ;;  %3874 = vmatprep.subr.mxu1 %v1328_v0  ;;  %s4266_s21 = scalar_lea.vmem %s4979_s0, %s3175_s18  ;;  %v1322_v11 = vld [vmem:[%s4982_s3 + $0x48] sm:$0xff]  ;;  %v1321_v12 = vld [vmem:[%s4982_s3 + $0x40] sm:$0xff]  ;;  %v1320_v14 = vld [vmem:[%s4982_s3 + $0x38] sm:$0xff]  ;;  %s4863_s25 = scalar_lea.vmem %s4988_s9, %s3175_s18 }
   0xe   : > { %3491 = vmatpush3.msra.mxu0 %v1328_v0  ;;  %3890 = vmatpush3.msra.mxu1 %v1328_v0  ;;  %v337_v5 = vld [vmem:[%s4266_s21 + $0x8] sm:$0xff]  ;;  %v336_v6 = vld [vmem:[%s4266_s21] sm:$0xff]  ;;  %v338_v10 = vld [vmem:[%s4266_s21 + $0x10] sm:$0xff] }
   0xf   : > { %3492 = vmatprep.subr.mxu0 %v1327_v2  ;;  %3875 = vmatprep.subr.mxu1 %v1327_v2  ;;  %v339_v13 = vld [vmem:[%s4266_s21 + $0x18] sm:$0xff]  ;;  %v1319_v15 = vld [vmem:[%s4982_s3 + $0x30] sm:$0xff]  ;;  %v340_v16 = vld [vmem:[%s4266_s21 + $0x20] sm:$0xff] }
  0x10   : > { %3493 = vmatpush3.msra.mxu0 %v1327_v2  ;;  %3891 = vmatpush3.msra.mxu1 %v1327_v2  ;;  %v1318_v17 = vld [vmem:[%s4982_s3 + $0x28] sm:$0xff]  ;;  %v1317_v18 = vld [vmem:[%s4982_s3 + $0x20] sm:$0xff]  ;;  %v1316_v20 = vld [vmem:[%s4982_s3 + $0x18] sm:$0xff] }
  0x11   : > { %3494 = vmatprep.subr.mxu0 %v1326_v3  ;;  %3876 = vmatprep.subr.mxu1 %v1326_v3  ;;  %v341_v19 = vld [vmem:[%s4266_s21 + $0x28] sm:$0xff]  ;;  %v1315_v21 = vld [vmem:[%s4982_s3 + $0x10] sm:$0xff]  ;;  %v1313_v24 = vld [vmem:[%s4982_s3] sm:$0xff] }
  0x12   : > { %3495 = vmatpush3.msra.mxu0 %v1326_v3  ;;  %3892 = vmatpush3.msra.mxu1 %v1326_v3  ;;  %v342_v22 = vld [vmem:[%s4266_s21 + $0x30] sm:$0xff]  ;;  %v1314_v23 = vld [vmem:[%s4982_s3 + $0x8] sm:$0xff]  ;;  %v343_v25 = vld [vmem:[%s4266_s21 + $0x38] sm:$0xff] }
  0x13   : > { %408 = vperm.xlu1 %3918, %v337_v5   ;;  %403 = vperm.xlu0 %3916, %v336_v6   ;;  %v344_v26 = vld [vmem:[%s4266_s21 + $0x40] sm:$0xff]  ;;  %v345_v27 = vld [vmem:[%s4266_s21 + $0x48] sm:$0xff]  ;;  %v346_v28 = vld [vmem:[%s4266_s21 + $0x50] sm:$0xff] }
  0x14   : > { %3496 = vmatprep.subr.mxu0 %v1325_v4  ;;  %3877 = vmatprep.subr.mxu1 %v1325_v4  ;;  %v347_v29 = vld [vmem:[%s4266_s21 + $0x58] sm:$0xff]  ;;  %v348_v30 = vld [vmem:[%s4266_s21 + $0x60] sm:$0xff]  ;;  %v349_v31 = vld [vmem:[%s4266_s21 + $0x68] sm:$0xff] }
  0x15   : > { %3497 = vmatpush3.msra.mxu0 %v1325_v4  ;;  %3893 = vmatpush3.msra.mxu1 %v1325_v4  ;;  %v350_v32 = vld [vmem:[%s4266_s21 + $0x70] sm:$0xff]  ;;  %v351_v33 = vld [vmem:[%s4266_s21 + $0x78] sm:$0xff]  ;;  %v352_v34 = vld [vmem:[%s4266_s21 + $0x80] sm:$0xff] }
  0x16   : > { %3498 = vmatprep.subr.mxu0 %v1324_v7  ;;  %3878 = vmatprep.subr.mxu1 %v1324_v7  ;;  %v353_v35 = vld [vmem:[%s4266_s21 + $0x88] sm:$0xff]  ;;  %v354_v36 = vld [vmem:[%s4266_s21 + $0x90] sm:$0xff]  ;;  %v355_v37 = vld [vmem:[%s4266_s21 + $0x98] sm:$0xff] }
  0x17   : > { %3919 = vset.pattern.permute.xlu1 %v4190_v8  ;;  %3917 = vset.pattern.permute.xlu0 %v4190_v8  ;;  %v356_v38 = vld [vmem:[%s4266_s21 + $0xa0] sm:$0xff]  ;;  %v357_v39 = vld [vmem:[%s4266_s21 + $0xa8] sm:$0xff]  ;;  %v358_v40 = vld [vmem:[%s4266_s21 + $0xb0] sm:$0xff] }
  0x18   : > { %795 = vperm.xlu1 %3919, %v337_v5   ;;  %791 = vperm.xlu0 %3917, %v336_v6   ;;  %v359_v41 = vld [vmem:[%s4266_s21 + $0xb8] sm:$0xff]  ;;  %v360_v42 = vld [vmem:[%s4266_s21 + $0xc0] sm:$0xff]  ;;  %v361_v43 = vld [vmem:[%s4266_s21 + $0xc8] sm:$0xff] }
  0x19   : > { %3499 = vmatpush3.msra.mxu0 %v1324_v7  ;;  %3894 = vmatpush3.msra.mxu1 %v1324_v7  ;;  %v362_v44 = vld [vmem:[%s4266_s21 + $0xd0] sm:$0xff]  ;;  %v363_v45 = vld [vmem:[%s4266_s21 + $0xd8] sm:$0xff]  ;;  %v364_v46 = vld [vmem:[%s4266_s21 + $0xe0] sm:$0xff] }
  0x1a   : > { %3500 = vmatprep.subr.mxu0 %v1323_v9  ;;  %3879 = vmatprep.subr.mxu1 %v1323_v9  ;;  %v365_v47 = vld [vmem:[%s4266_s21 + $0xe8] sm:$0xff]  ;;  %v366_v48 = vld [vmem:[%s4266_s21 + $0xf0] sm:$0xff]  ;;  %v367_v49 = vld [vmem:[%s4266_s21 + $0xf8] sm:$0xff] }
  0x1b   : > { %3501 = vmatpush3.msra.mxu0 %v1323_v9  ;;  %3895 = vmatpush3.msra.mxu1 %v1323_v9  ;;  %v4342_v52 = vld [vmem:[%s4980_s1] ss:$0 sm:$0xff]  ;;  %v4347_v53 = vld [vmem:[%s4980_s1 + $0x1] ss:$0 sm:$0xff]  ;;  %v369_v61 = vld [vmem:[%s4266_s21 + $0x108] sm:$0xff] }
  0x1c   : > { %3920 = vset.pattern.permute.xlu1 %v4189_v1  ;;  %799 = vperm.xlu0 %3917, %v338_v10   ;;  %v368_v54 = vld [vmem:[%s4266_s21 + $0x100] sm:$0xff]  ;;  %v370_v7 = vld [vmem:[%s4266_s21 + $0x110] sm:$0xff] }
  0x1d   : > { %413 = vperm.xlu1 %3920, %v338_v10   ;;  %3502 = vmatprep.subr.mxu0 %v1322_v11  ;;  %v4358_v62 = vld [vmem:[%s4981_s2] ss:$0 sm:$0xff] }
  0x1e   : > { %3503 = vmatpush3.msra.mxu0 %v1322_v11  ;;  %3880 = vmatprep.subr.mxu1 %v1322_v11 }
  0x1f   : > { %3504 = vmatprep.subr.mxu0 %v1321_v12  ;;  %3896 = vmatpush3.msra.mxu1 %v1322_v11 }
  0x20   : > { %803 = vperm.xlu0 %3917, %v339_v13   ;;  %3505 = vmatpush3.msra.mxu0 %v1321_v12 }
  0x21   : > { %418 = vperm.xlu1 %3920, %v339_v13   ;;  %3506 = vmatprep.subr.mxu0 %v1320_v14 }
  0x22   : > { %3507 = vmatpush3.msra.mxu0 %v1320_v14  ;;  %3881 = vmatprep.subr.mxu1 %v1321_v12 }
  0x23   : > { %3508 = vmatprep.subr.mxu0 %v1319_v15  ;;  %3897 = vmatpush3.msra.mxu1 %v1321_v12 }
  0x24   : > { %807 = vperm.xlu0 %3917, %v340_v16   ;;  %3509 = vmatpush3.msra.mxu0 %v1319_v15 }
  0x25   : > { %423 = vperm.xlu1 %3920, %v340_v16   ;;  %3510 = vmatprep.subr.mxu0 %v1318_v17 }
  0x26   : > { %3511 = vmatpush3.msra.mxu0 %v1318_v17  ;;  %3882 = vmatprep.subr.mxu1 %v1320_v14 }
  0x27   : > { %3512 = vmatprep.subr.mxu0 %v1317_v18  ;;  %3898 = vmatpush3.msra.mxu1 %v1320_v14 }
  0x28   : > { %811 = vperm.xlu0 %3917, %v341_v19   ;;  %3513 = vmatpush3.msra.mxu0 %v1317_v18 }
  0x29   : > { %428 = vperm.xlu1 %3920, %v341_v19   ;;  %3514 = vmatprep.subr.mxu0 %v1316_v20 }
  0x2a   : > { %3515 = vmatpush3.msra.mxu0 %v1316_v20  ;;  %3883 = vmatprep.subr.mxu1 %v1319_v15 }
  0x2b   : > { %3516 = vmatprep.subr.mxu0 %v1315_v21  ;;  %3899 = vmatpush3.msra.mxu1 %v1319_v15  ;;  %v371_v15 = vld [vmem:[%s4266_s21 + $0x118] sm:$0xff] }
  0x2c   : > { %815 = vperm.xlu0 %3917, %v342_v22   ;;  %3517 = vmatpush3.msra.mxu0 %v1315_v21 }
  0x2d   : > { %433 = vperm.xlu1 %3920, %v342_v22   ;;  %3518 = vmatprep.subr.mxu0 %v1314_v23 }
  0x2e   : > { %3519 = vmatpush3.msra.mxu0 %v1314_v23  ;;  %3884 = vmatprep.subr.mxu1 %v1318_v17 }
  0x2f   : > { %3520 = vmatprep.subr.mxu0 %v1313_v24  ;;  %3900 = vmatpush3.msra.mxu1 %v1318_v17 }
  0x30   : > { %819 = vperm.xlu0 %3917, %v343_v25   ;;  %3521 = vmatpush3.msra.mxu0 %v1313_v24 }
  0x31   : > { %438 = vperm.xlu1 %3920, %v343_v25   ;;  %3885 = vmatprep.subr.mxu1 %v1317_v18 }
  0x32   : > { %3901 = vmatpush3.msra.mxu1 %v1317_v18 }
  0x33   : > { %3886 = vmatprep.subr.mxu1 %v1316_v20 }
  0x34   : > { %823 = vperm.xlu0 %3917, %v344_v26   ;;  %3902 = vmatpush3.msra.mxu1 %v1316_v20 }
  0x35   : > { %443 = vperm.xlu1 %3920, %v344_v26   ;;  %3887 = vmatprep.subr.mxu1 %v1315_v21 }
  0x36   : > { %3903 = vmatpush3.msra.mxu1 %v1315_v21 }
  0x37   : > { %3888 = vmatprep.subr.mxu1 %v1314_v23 }
  0x38   : > { %827 = vperm.xlu0 %3917, %v345_v27   ;;  %3904 = vmatpush3.msra.mxu1 %v1314_v23  ;;  %v372_v23 = vld [vmem:[%s4266_s21 + $0x120] sm:$0xff] }
  0x39   : > { %448 = vperm.xlu1 %3920, %v345_v27   ;;  %3889 = vmatprep.subr.mxu1 %v1313_v24 }
  0x3a   : > { %3905 = vmatpush3.msra.mxu1 %v1313_v24 }
  0x3c   : > { %831 = vperm.xlu0 %3917, %v346_v28  }
  0x3d   : > { %453 = vperm.xlu1 %3920, %v346_v28  }
  0x40   : > { %835 = vperm.xlu0 %3917, %v347_v29  }
  0x41   : > { %458 = vperm.xlu1 %3920, %v347_v29  }
  0x44   : > { %839 = vperm.xlu0 %3917, %v348_v30  }
  0x45   : > { %463 = vperm.xlu1 %3920, %v348_v30  }
  0x48   : > { %843 = vperm.xlu0 %3917, %v349_v31  }
  0x49   : > { %468 = vperm.xlu1 %3920, %v349_v31   ;;  %v373_v31 = vld [vmem:[%s4266_s21 + $0x128] sm:$0xff] }
  0x4c   : > { %847 = vperm.xlu0 %3917, %v350_v32  }
  0x4d   : > { %473 = vperm.xlu1 %3920, %v350_v32  }
  0x50   : > { %851 = vperm.xlu0 %3917, %v351_v33  }
  0x51   : > { %478 = vperm.xlu1 %3920, %v351_v33  }
  0x54   : > { %855 = vperm.xlu0 %3917, %v352_v34  }
  0x55   : > { %483 = vperm.xlu1 %3920, %v352_v34  }
  0x58   : > { %859 = vperm.xlu0 %3917, %v353_v35  }
  0x59   : > { %488 = vperm.xlu1 %3920, %v353_v35  }
  0x5c   : > { %863 = vperm.xlu0 %3917, %v354_v36  }
  0x5d   : > { %493 = vperm.xlu1 %3920, %v354_v36  }
  0x60   : > { %867 = vperm.xlu0 %3917, %v355_v37  }
  0x61   : > { %498 = vperm.xlu1 %3920, %v355_v37  }
  0x64   : > { %871 = vperm.xlu0 %3917, %v356_v38  }
  0x65   : > { %503 = vperm.xlu1 %3920, %v356_v38  }
  0x68   : > { %875 = vperm.xlu0 %3917, %v357_v39  }
  0x69   : > { %508 = vperm.xlu1 %3920, %v357_v39   ;;  %v374_v39 = vld [vmem:[%s4266_s21 + $0x130] sm:$0xff] }
  0x6c   : > { %879 = vperm.xlu0 %3917, %v358_v40  }
  0x6d   : > { %513 = vperm.xlu1 %3920, %v358_v40  }
  0x70   : > { %883 = vperm.xlu0 %3917, %v359_v41  }
  0x71   : > { %518 = vperm.xlu1 %3920, %v359_v41  }
  0x74   : > { %887 = vperm.xlu0 %3917, %v360_v42  }
  0x75   : > { %523 = vperm.xlu1 %3920, %v360_v42  }
  0x78   : > { %891 = vperm.xlu0 %3917, %v361_v43  }
  0x79   : > { %528 = vperm.xlu1 %3920, %v361_v43  }
  0x7c   : > { %895 = vperm.xlu0 %3917, %v362_v44  }
  0x7d   : > { %533 = vperm.xlu1 %3920, %v362_v44  }
  0x80   : > { %899 = vperm.xlu0 %3917, %v363_v45  }
  0x81   : > { %538 = vperm.xlu1 %3920, %v363_v45  }
  0x84   : > { %903 = vperm.xlu0 %3917, %v364_v46  }
  0x85   : > { %543 = vperm.xlu1 %3920, %v364_v46  }
  0x88   : > { %907 = vperm.xlu0 %3917, %v365_v47  }
  0x89   : > { %548 = vperm.xlu1 %3920, %v365_v47   ;;  %v375_v47 = vld [vmem:[%s4266_s21 + $0x138] sm:$0xff] }
  0x8c   : > { %911 = vperm.xlu0 %3917, %v366_v48  }
  0x8d   : > { %553 = vperm.xlu1 %3920, %v366_v48  }
  0x8e   : > { %v409_v50 = vpop.permute.xlu1 %408  ;;  %v404_v51 = vpop.permute.xlu0 %403 }
  0x8f   : > { %v726_v57 = vmul.f32 %v4342_v52, %v409_v50  ;;  %v725_v58 = vmul.f32 %v4342_v52, %v404_v51 }
  0x90   : > { %915 = vperm.xlu0 %3917, %v367_v49  }
  0x91   : > { %558 = vperm.xlu1 %3920, %v367_v49  }
  0x93   : > { %v796_v55 = vpop.permute.xlu1 %795  ;;  %v792_v56 = vpop.permute.xlu0 %791 }
  0x94   : > { %v1051_v59 = vmul.f32 %v4347_v53, %v796_v55  ;;  %v1050_v60 = vmul.f32 %v4347_v53, %v792_v56  ;;  %919 = vperm.xlu0 %3917, %v368_v54  }
  0x95   : > { %563 = vperm.xlu1 %3920, %v368_v54  }
  0x96   : > { %v1115_v63 = vadd.f32 %v1051_v59, %v726_v57  ;;  %v1114_v0 = vadd.f32 %v1050_v60, %v725_v58  ;;  %v376_v57 = vld [vmem:[%s4266_s21 + $0x140] sm:$0xff] }
  0x97   : > { %v800_v1 = vpop.permute.xlu0 %799 }
  0x98   : > { %v1052_v2 = vmul.f32 %v4347_v53, %v800_v1  ;;  %v414_v3 = vpop.permute.xlu1 %413  ;;  %923 = vperm.xlu0 %3917, %v369_v61   ;;  %v1185_v4 = vadd.f32 %v4358_v62, %v1114_v0  ;;  %v1186_v5 = vadd.f32 %v4358_v62, %v1115_v63 }
  0x99   : > { %v727_v6 = vmul.f32 %v4342_v52, %v414_v3  ;;  %568 = vperm.xlu1 %3920, %v369_v61  }
  0x9a   : > { %v1249_v8 = vmax.f32 %v1185_v4, 0.0  ;;  %v1250_v9 = vmax.f32 %v1186_v5, 0.0 }
  0x9b   : > { %v1116_v10 = vadd.f32 %v1052_v2, %v727_v6  ;;  %v804_v11 = vpop.permute.xlu0 %803  ;;  %v377_v2 = vld [vmem:[%s4266_s21 + $0x148] sm:$0xff] }
  0x9c   : > { %v1053_v12 = vmul.f32 %v4347_v53, %v804_v11  ;;  %v419_v13 = vpop.permute.xlu1 %418  ;;  %927 = vperm.xlu0 %3917, %v370_v7   ;;  %3522 = vmatprep.mubr.f32.mxu0 %v1249_v8 }
  0x9d   : > { %v728_v14 = vmul.f32 %v4342_v52, %v419_v13  ;;  %573 = vperm.xlu1 %3920, %v370_v7   ;;  %3523 = vmatmul.mubr.f32.vlgmr.msra.gmra.mxu0 %v1250_v9  ;;  %v1187_v16 = vadd.f32 %v4358_v62, %v1116_v10  ;;  %v378_v10 = vld [vmem:[%s4266_s21 + $0x150] sm:$0xff] }
  0x9f   : > { %v1117_v17 = vadd.f32 %v1053_v12, %v728_v14  ;;  %v808_v18 = vpop.permute.xlu0 %807  ;;  %v1251_v19 = vmax.f32 %v1187_v16, 0.0 }
  0xa0   : > { %v1054_v20 = vmul.f32 %v4347_v53, %v808_v18  ;;  %v424_v21 = vpop.permute.xlu1 %423  ;;  %931 = vperm.xlu0 %3917, %v371_v15   ;;  %v379_v18 = vld [vmem:[%s4266_s21 + $0x158] sm:$0xff] }
  0xa1   : > { %v729_v22 = vmul.f32 %v4342_v52, %v424_v21  ;;  %578 = vperm.xlu1 %3920, %v371_v15   ;;  %3525 = vmatprep.mubr.f32.mxu0 %v1251_v19  ;;  %v1188_v24 = vadd.f32 %v4358_v62, %v1117_v17 }
  0xa3   : > { %v1118_v25 = vadd.f32 %v1054_v20, %v729_v22  ;;  %v812_v26 = vpop.permute.xlu0 %811  ;;  %v1252_v27 = vmax.f32 %v1188_v24, 0.0 }
  0xa4   : > { %v1055_v28 = vmul.f32 %v4347_v53, %v812_v26  ;;  %v429_v29 = vpop.permute.xlu1 %428  ;;  %935 = vperm.xlu0 %3917, %v372_v23   ;;  %v380_v26 = vld [vmem:[%s4266_s21 + $0x160] sm:$0xff] }
  0xa5   : > { %v730_v30 = vmul.f32 %v4342_v52, %v429_v29  ;;  %583 = vperm.xlu1 %3920, %v372_v23   ;;  %3526 = vmatmul.mubr.f32.gmra.mxu0 %v1252_v27  ;;  %v1189_v32 = vadd.f32 %v4358_v62, %v1118_v25 }
  0xa7   : > { %v1119_v33 = vadd.f32 %v1055_v28, %v730_v30  ;;  %v816_v34 = vpop.permute.xlu0 %815  ;;  %v1253_v35 = vmax.f32 %v1189_v32, 0.0 }
  0xa8   : > { %v1056_v36 = vmul.f32 %v4347_v53, %v816_v34  ;;  %v434_v37 = vpop.permute.xlu1 %433  ;;  %939 = vperm.xlu0 %3917, %v373_v31   ;;  %v381_v34 = vld [vmem:[%s4266_s21 + $0x168] sm:$0xff] }
  0xa9   : > { %v731_v38 = vmul.f32 %v4342_v52, %v434_v37  ;;  %588 = vperm.xlu1 %3920, %v373_v31   ;;  %3528 = vmatprep.mubr.f32.mxu0 %v1253_v35  ;;  %v1190_v40 = vadd.f32 %v4358_v62, %v1119_v33 }
  0xab   : > { %v1120_v41 = vadd.f32 %v1056_v36, %v731_v38  ;;  %v820_v42 = vpop.permute.xlu0 %819  ;;  %v1254_v43 = vmax.f32 %v1190_v40, 0.0 }
  0xac   : > { %v1057_v44 = vmul.f32 %v4347_v53, %v820_v42  ;;  %v439_v45 = vpop.permute.xlu1 %438  ;;  %943 = vperm.xlu0 %3917, %v374_v39   ;;  %v382_v42 = vld [vmem:[%s4266_s21 + $0x170] sm:$0xff] }
  0xad   : > { %v732_v46 = vmul.f32 %v4342_v52, %v439_v45  ;;  %593 = vperm.xlu1 %3920, %v374_v39   ;;  %3529 = vmatmul.mubr.f32.gmra.mxu0 %v1254_v43  ;;  %v1191_v48 = vadd.f32 %v4358_v62, %v1120_v41 }
  0xaf   : > { %v1121_v49 = vadd.f32 %v1057_v44, %v732_v46  ;;  %v824_v50 = vpop.permute.xlu0 %823  ;;  %v1255_v51 = vmax.f32 %v1191_v48, 0.0 }
  0xb0   : > { %v1058_v54 = vmul.f32 %v4347_v53, %v824_v50  ;;  %v444_v55 = vpop.permute.xlu1 %443  ;;  %947 = vperm.xlu0 %3917, %v375_v47   ;;  %v383_v50 = vld [vmem:[%s4266_s21 + $0x178] sm:$0xff] }
  0xb1   : > { %v733_v56 = vmul.f32 %v4342_v52, %v444_v55  ;;  %598 = vperm.xlu1 %3920, %v375_v47   ;;  %3531 = vmatprep.mubr.f32.mxu0 %v1255_v51  ;;  %v1192_v58 = vadd.f32 %v4358_v62, %v1121_v49 }
  0xb3   : > { %v1122_v59 = vadd.f32 %v1058_v54, %v733_v56  ;;  %v828_v60 = vpop.permute.xlu0 %827  ;;  %v1256_v61 = vmax.f32 %v1192_v58, 0.0 }
  0xb4   : > { %v1059_v63 = vmul.f32 %v4347_v53, %v828_v60  ;;  %v449_v0 = vpop.permute.xlu1 %448  ;;  %951 = vperm.xlu0 %3917, %v376_v57   ;;  %v384_v60 = vld [vmem:[%s4266_s21 + $0x180] sm:$0xff] }
  0xb5   : > { %v734_v1 = vmul.f32 %v4342_v52, %v449_v0  ;;  %603 = vperm.xlu1 %3920, %v376_v57   ;;  %3532 = vmatmul.mubr.f32.gmra.mxu0 %v1256_v61  ;;  %v1193_v3 = vadd.f32 %v4358_v62, %v1122_v59 }
  0xb7   : > { %v1123_v4 = vadd.f32 %v1059_v63, %v734_v1  ;;  %v832_v5 = vpop.permute.xlu0 %831  ;;  %v1257_v6 = vmax.f32 %v1193_v3, 0.0 }
  0xb8   : > { %v1060_v7 = vmul.f32 %v4347_v53, %v832_v5  ;;  %v454_v8 = vpop.permute.xlu1 %453  ;;  %955 = vperm.xlu0 %3917, %v377_v2   ;;  %v385_v5 = vld [vmem:[%s4266_s21 + $0x188] sm:$0xff] }
  0xb9   : > { %v735_v9 = vmul.f32 %v4342_v52, %v454_v8  ;;  %608 = vperm.xlu1 %3920, %v377_v2   ;;  %3534 = vmatprep.mubr.f32.mxu0 %v1257_v6  ;;  %v1194_v11 = vadd.f32 %v4358_v62, %v1123_v4 }
  0xbb   : > { %v1124_v12 = vadd.f32 %v1060_v7, %v735_v9  ;;  %v836_v13 = vpop.permute.xlu0 %835  ;;  %v1258_v14 = vmax.f32 %v1194_v11, 0.0 }
  0xbc   : > { %v1061_v15 = vmul.f32 %v4347_v53, %v836_v13  ;;  %v459_v16 = vpop.permute.xlu1 %458  ;;  %959 = vperm.xlu0 %3917, %v378_v10   ;;  %v386_v13 = vld [vmem:[%s4266_s21 + $0x190] sm:$0xff] }
  0xbd   : > { %v736_v17 = vmul.f32 %v4342_v52, %v459_v16  ;;  %613 = vperm.xlu1 %3920, %v378_v10   ;;  %3535 = vmatmul.mubr.f32.gmra.mxu0 %v1258_v14  ;;  %v1195_v19 = vadd.f32 %v4358_v62, %v1124_v12 }
  0xbf   : > { %v1125_v20 = vadd.f32 %v1061_v15, %v736_v17  ;;  %v840_v21 = vpop.permute.xlu0 %839  ;;  %v1259_v22 = vmax.f32 %v1195_v19, 0.0 }
  0xc0   : > { %v1062_v23 = vmul.f32 %v4347_v53, %v840_v21  ;;  %v464_v24 = vpop.permute.xlu1 %463  ;;  %963 = vperm.xlu0 %3917, %v379_v18   ;;  %v387_v21 = vld [vmem:[%s4266_s21 + $0x198] sm:$0xff] }
  0xc1   : > { %v737_v25 = vmul.f32 %v4342_v52, %v464_v24  ;;  %618 = vperm.xlu1 %3920, %v379_v18   ;;  %3537 = vmatprep.mubr.f32.mxu0 %v1259_v22  ;;  %v1196_v27 = vadd.f32 %v4358_v62, %v1125_v20 }
  0xc3   : > { %v1126_v28 = vadd.f32 %v1062_v23, %v737_v25  ;;  %v844_v29 = vpop.permute.xlu0 %843  ;;  %v1260_v30 = vmax.f32 %v1196_v27, 0.0 }
  0xc4   : > { %v1063_v31 = vmul.f32 %v4347_v53, %v844_v29  ;;  %v469_v32 = vpop.permute.xlu1 %468  ;;  %967 = vperm.xlu0 %3917, %v380_v26   ;;  %v388_v29 = vld [vmem:[%s4266_s21 + $0x1a0] sm:$0xff] }
  0xc5   : > { %v738_v33 = vmul.f32 %v4342_v52, %v469_v32  ;;  %623 = vperm.xlu1 %3920, %v380_v26   ;;  %3538 = vmatmul.mubr.f32.gmra.mxu0 %v1260_v30  ;;  %v1197_v35 = vadd.f32 %v4358_v62, %v1126_v28 }
  0xc7   : > { %v1127_v36 = vadd.f32 %v1063_v31, %v738_v33  ;;  %v848_v37 = vpop.permute.xlu0 %847  ;;  %v1261_v38 = vmax.f32 %v1197_v35, 0.0 }
  0xc8   : > { %v1064_v39 = vmul.f32 %v4347_v53, %v848_v37  ;;  %v474_v40 = vpop.permute.xlu1 %473  ;;  %971 = vperm.xlu0 %3917, %v381_v34   ;;  %v389_v37 = vld [vmem:[%s4266_s21 + $0x1a8] sm:$0xff] }
  0xc9   : > { %v739_v41 = vmul.f32 %v4342_v52, %v474_v40  ;;  %628 = vperm.xlu1 %3920, %v381_v34   ;;  %3540 = vmatprep.mubr.f32.mxu0 %v1261_v38  ;;  %v1198_v43 = vadd.f32 %v4358_v62, %v1127_v36 }
  0xcb   : > { %v1128_v44 = vadd.f32 %v1064_v39, %v739_v41  ;;  %v852_v45 = vpop.permute.xlu0 %851  ;;  %v1262_v46 = vmax.f32 %v1198_v43, 0.0 }
  0xcc   : > { %v1065_v47 = vmul.f32 %v4347_v53, %v852_v45  ;;  %v479_v48 = vpop.permute.xlu1 %478  ;;  %975 = vperm.xlu0 %3917, %v382_v42   ;;  %v390_v45 = vld [vmem:[%s4266_s21 + $0x1b0] sm:$0xff] }
  0xcd   : > { %v740_v49 = vmul.f32 %v4342_v52, %v479_v48  ;;  %633 = vperm.xlu1 %3920, %v382_v42   ;;  %3541 = vmatmul.mubr.f32.gmra.mxu0 %v1262_v46  ;;  %v1199_v51 = vadd.f32 %v4358_v62, %v1128_v44 }
  0xcf   : > { %v1129_v54 = vadd.f32 %v1065_v47, %v740_v49  ;;  %v856_v55 = vpop.permute.xlu0 %855  ;;  %v1263_v56 = vmax.f32 %v1199_v51, 0.0 }
  0xd0   : > { %v1066_v57 = vmul.f32 %v4347_v53, %v856_v55  ;;  %v484_v58 = vpop.permute.xlu1 %483  ;;  %979 = vperm.xlu0 %3917, %v383_v50   ;;  %v391_v55 = vld [vmem:[%s4266_s21 + $0x1b8] sm:$0xff] }
  0xd1   : > { %v741_v59 = vmul.f32 %v4342_v52, %v484_v58  ;;  %638 = vperm.xlu1 %3920, %v383_v50   ;;  %3543 = vmatprep.mubr.f32.mxu0 %v1263_v56  ;;  %v1200_v61 = vadd.f32 %v4358_v62, %v1129_v54 }
  0xd3   : > { %v1130_v63 = vadd.f32 %v1066_v57, %v741_v59  ;;  %v860_v0 = vpop.permute.xlu0 %859  ;;  %v1264_v1 = vmax.f32 %v1200_v61, 0.0 }
  0xd4   : > { %v1067_v2 = vmul.f32 %v4347_v53, %v860_v0  ;;  %v489_v3 = vpop.permute.xlu1 %488  ;;  %983 = vperm.xlu0 %3917, %v384_v60   ;;  %v392_v0 = vld [vmem:[%s4266_s21 + $0x1c0] sm:$0xff] }
  0xd5   : > { %v742_v4 = vmul.f32 %v4342_v52, %v489_v3  ;;  %643 = vperm.xlu1 %3920, %v384_v60   ;;  %3544 = vmatmul.mubr.f32.gmra.mxu0 %v1264_v1  ;;  %v1201_v6 = vadd.f32 %v4358_v62, %v1130_v63 }
  0xd7   : > { %v1131_v7 = vadd.f32 %v1067_v2, %v742_v4  ;;  %v864_v8 = vpop.permute.xlu0 %863  ;;  %v1265_v9 = vmax.f32 %v1201_v6, 0.0 }
  0xd8   : > { %v1068_v10 = vmul.f32 %v4347_v53, %v864_v8  ;;  %v494_v11 = vpop.permute.xlu1 %493  ;;  %987 = vperm.xlu0 %3917, %v385_v5   ;;  %v393_v8 = vld [vmem:[%s4266_s21 + $0x1c8] sm:$0xff] }
  0xd9   : > { %v743_v12 = vmul.f32 %v4342_v52, %v494_v11  ;;  %648 = vperm.xlu1 %3920, %v385_v5   ;;  %3546 = vmatprep.mubr.f32.mxu0 %v1265_v9  ;;  %v1202_v14 = vadd.f32 %v4358_v62, %v1131_v7 }
  0xdb   : > { %v1132_v15 = vadd.f32 %v1068_v10, %v743_v12  ;;  %v868_v16 = vpop.permute.xlu0 %867  ;;  %v1266_v17 = vmax.f32 %v1202_v14, 0.0 }
  0xdc   : > { %v1069_v18 = vmul.f32 %v4347_v53, %v868_v16  ;;  %v499_v19 = vpop.permute.xlu1 %498  ;;  %991 = vperm.xlu0 %3917, %v386_v13  }
  0xdd   : > { %v744_v20 = vmul.f32 %v4342_v52, %v499_v19  ;;  %653 = vperm.xlu1 %3920, %v386_v13   ;;  %3547 = vmatmul.mubr.f32.gmra.mxu0 %v1266_v17  ;;  %v1203_v22 = vadd.f32 %v4358_v62, %v1132_v15  ;;  %v4461_v15 = vld [vmem:[%s4984_s5 + $0x78] sm:$0xff]  ;;  %v394_v17 = vld [vmem:[%s4266_s21 + $0x1d0] sm:$0xff] }
  0xde   : > { %3618 = vmatprep.subr.mxu1 %v4461_v15 }
  0xdf   : > { %v1133_v23 = vadd.f32 %v1069_v18, %v744_v20  ;;  %v872_v24 = vpop.permute.xlu0 %871  ;;  %v1267_v25 = vmax.f32 %v1203_v22, 0.0 }
  0xe0   : > { %v1070_v26 = vmul.f32 %v4347_v53, %v872_v24  ;;  %v504_v27 = vpop.permute.xlu1 %503  ;;  %995 = vperm.xlu0 %3917, %v387_v21  }
  0xe1   : > { %v745_v28 = vmul.f32 %v4342_v52, %v504_v27  ;;  %658 = vperm.xlu1 %3920, %v387_v21   ;;  %3549 = vmatprep.mubr.f32.mxu0 %v1267_v25  ;;  %v1204_v30 = vadd.f32 %v4358_v62, %v1133_v23  ;;  %v395_v25 = vld [vmem:[%s4266_s21 + $0x1d8] sm:$0xff] }
  0xe3   : > { %v1134_v31 = vadd.f32 %v1070_v26, %v745_v28  ;;  %v876_v32 = vpop.permute.xlu0 %875  ;;  %v1268_v33 = vmax.f32 %v1204_v30, 0.0 }
  0xe4   : > { %v1071_v34 = vmul.f32 %v4347_v53, %v876_v32  ;;  %v509_v35 = vpop.permute.xlu1 %508  ;;  %999 = vperm.xlu0 %3917, %v388_v29  }
  0xe5   : > { %v746_v36 = vmul.f32 %v4342_v52, %v509_v35  ;;  %663 = vperm.xlu1 %3920, %v388_v29   ;;  %3550 = vmatmul.mubr.f32.gmra.mxu0 %v1268_v33  ;;  %v1205_v38 = vadd.f32 %v4358_v62, %v1134_v31  ;;  %v396_v33 = vld [vmem:[%s4266_s21 + $0x1e0] sm:$0xff] }
  0xe7   : > { %v1135_v39 = vadd.f32 %v1071_v34, %v746_v36  ;;  %v880_v40 = vpop.permute.xlu0 %879  ;;  %v1269_v41 = vmax.f32 %v1205_v38, 0.0 }
  0xe8   : > { %v1072_v42 = vmul.f32 %v4347_v53, %v880_v40  ;;  %v514_v43 = vpop.permute.xlu1 %513  ;;  %1003 = vperm.xlu0 %3917, %v389_v37  }
  0xe9   : > { %v747_v44 = vmul.f32 %v4342_v52, %v514_v43  ;;  %668 = vperm.xlu1 %3920, %v389_v37   ;;  %3552 = vmatprep.mubr.f32.mxu0 %v1269_v41  ;;  %v1206_v46 = vadd.f32 %v4358_v62, %v1135_v39  ;;  %v397_v41 = vld [vmem:[%s4266_s21 + $0x1e8] sm:$0xff] }
  0xeb   : > { %v1136_v47 = vadd.f32 %v1072_v42, %v747_v44  ;;  %v884_v48 = vpop.permute.xlu0 %883  ;;  %v1270_v49 = vmax.f32 %v1206_v46, 0.0 }
  0xec   : > { %v1073_v50 = vmul.f32 %v4347_v53, %v884_v48  ;;  %v519_v51 = vpop.permute.xlu1 %518  ;;  %1007 = vperm.xlu0 %3917, %v390_v45  }
  0xed   : > { %v748_v54 = vmul.f32 %v4342_v52, %v519_v51  ;;  %673 = vperm.xlu1 %3920, %v390_v45   ;;  %3553 = vmatmul.mubr.f32.gmra.mxu0 %v1270_v49  ;;  %v1207_v56 = vadd.f32 %v4358_v62, %v1136_v47  ;;  %v398_v49 = vld [vmem:[%s4266_s21 + $0x1f0] sm:$0xff] }
  0xef   : > { %v1137_v57 = vadd.f32 %v1073_v50, %v748_v54  ;;  %v888_v58 = vpop.permute.xlu0 %887  ;;  %v1271_v59 = vmax.f32 %v1207_v56, 0.0 }
  0xf0   : > { %v1074_v60 = vmul.f32 %v4347_v53, %v888_v58  ;;  %v524_v61 = vpop.permute.xlu1 %523  ;;  %1011 = vperm.xlu0 %3917, %v391_v55  }
  0xf1   : > { %v749_v63 = vmul.f32 %v4342_v52, %v524_v61  ;;  %678 = vperm.xlu1 %3920, %v391_v55   ;;  %3555 = vmatprep.mubr.f32.mxu0 %v1271_v59  ;;  %v1208_v1 = vadd.f32 %v4358_v62, %v1137_v57  ;;  %v399_v59 = vld [vmem:[%s4266_s21 + $0x1f8] sm:$0xff] }
  0xf3   : > { %v1138_v2 = vadd.f32 %v1074_v60, %v749_v63  ;;  %v892_v3 = vpop.permute.xlu0 %891  ;;  %v1272_v4 = vmax.f32 %v1208_v1, 0.0 }
  0xf4   : > { %v1075_v5 = vmul.f32 %v4347_v53, %v892_v3  ;;  %v529_v6 = vpop.permute.xlu1 %528  ;;  %1015 = vperm.xlu0 %3917, %v392_v0  }
  0xf5   : > { %v750_v7 = vmul.f32 %v4342_v52, %v529_v6  ;;  %683 = vperm.xlu1 %3920, %v392_v0   ;;  %3556 = vmatmul.mubr.f32.gmra.mxu0 %v1272_v4  ;;  %v1209_v9 = vadd.f32 %v4358_v62, %v1138_v2 }
  0xf7   : > { %v1139_v10 = vadd.f32 %v1075_v5, %v750_v7  ;;  %v896_v11 = vpop.permute.xlu0 %895  ;;  %v1273_v12 = vmax.f32 %v1209_v9, 0.0 }
  0xf8   : > { %v1076_v13 = vmul.f32 %v4347_v53, %v896_v11  ;;  %v534_v14 = vpop.permute.xlu1 %533  ;;  %1019 = vperm.xlu0 %3917, %v393_v8  }
  0xf9   : > { %v751_v16 = vmul.f32 %v4342_v52, %v534_v14  ;;  %688 = vperm.xlu1 %3920, %v393_v8   ;;  %3558 = vmatprep.mubr.f32.mxu0 %v1273_v12  ;;  %v1210_v18 = vadd.f32 %v4358_v62, %v1139_v10 }
  0xfb   : > { %v1140_v19 = vadd.f32 %v1076_v13, %v751_v16  ;;  %v900_v20 = vpop.permute.xlu0 %899  ;;  %v1274_v21 = vmax.f32 %v1210_v18, 0.0 }
  0xfc   : > { %v1077_v22 = vmul.f32 %v4347_v53, %v900_v20  ;;  %v539_v23 = vpop.permute.xlu1 %538  ;;  %1023 = vperm.xlu0 %3917, %v394_v17  }
  0xfd   : > { %v752_v24 = vmul.f32 %v4342_v52, %v539_v23  ;;  %693 = vperm.xlu1 %3920, %v394_v17   ;;  %3559 = vmatmul.mubr.f32.gmra.mxu0 %v1274_v21  ;;  %v1211_v26 = vadd.f32 %v4358_v62, %v1140_v19 }
  0xff   : > { %v1141_v27 = vadd.f32 %v1077_v22, %v752_v24  ;;  %v904_v28 = vpop.permute.xlu0 %903  ;;  %v1275_v29 = vmax.f32 %v1211_v26, 0.0 }
 0x100   : > { %v1078_v30 = vmul.f32 %v4347_v53, %v904_v28  ;;  %v544_v31 = vpop.permute.xlu1 %543  ;;  %1027 = vperm.xlu0 %3917, %v395_v25   ;;  %v1798_v28 = vld [vmem:[%s4984_s5 + $0x68] sm:$0xff] }
 0x101   : > { %v753_v32 = vmul.f32 %v4342_v52, %v544_v31  ;;  %698 = vperm.xlu1 %3920, %v395_v25   ;;  %3561 = vmatprep.mubr.f32.mxu0 %v1275_v29  ;;  %v1212_v34 = vadd.f32 %v4358_v62, %v1141_v27  ;;  %v1799_v25 = vld [vmem:[%s4984_s5 + $0x70] sm:$0xff] }
 0x103   : > { %v1142_v35 = vadd.f32 %v1078_v30, %v753_v32  ;;  %v908_v36 = vpop.permute.xlu0 %907  ;;  %v1276_v37 = vmax.f32 %v1212_v34, 0.0  ;;  %v1797_v34 = vld [vmem:[%s4984_s5 + $0x60] sm:$0xff] }
 0x104   : > { %v1079_v38 = vmul.f32 %v4347_v53, %v908_v36  ;;  %v549_v39 = vpop.permute.xlu1 %548  ;;  %1031 = vperm.xlu0 %3917, %v396_v33   ;;  %v1796_v36 = vld [vmem:[%s4984_s5 + $0x58] sm:$0xff] }
 0x105   : > { %v754_v40 = vmul.f32 %v4342_v52, %v549_v39  ;;  %703 = vperm.xlu1 %3920, %v396_v33   ;;  %3562 = vmatmul.mubr.f32.gmra.mxu0 %v1276_v37  ;;  %v1213_v42 = vadd.f32 %v4358_v62, %v1142_v35 }
 0x107   : > { %v1143_v43 = vadd.f32 %v1079_v38, %v754_v40  ;;  %v912_v44 = vpop.permute.xlu0 %911  ;;  %v1277_v45 = vmax.f32 %v1213_v42, 0.0  ;;  %v1795_v42 = vld [vmem:[%s4984_s5 + $0x50] sm:$0xff] }
 0x108   : > { %v1080_v46 = vmul.f32 %v4347_v53, %v912_v44  ;;  %v554_v47 = vpop.permute.xlu1 %553  ;;  %1035 = vperm.xlu0 %3917, %v397_v41  }
 0x109   : > { %v755_v48 = vmul.f32 %v4342_v52, %v554_v47  ;;  %708 = vperm.xlu1 %3920, %v397_v41   ;;  %3564 = vmatprep.mubr.f32.mxu0 %v1277_v45  ;;  %v1214_v50 = vadd.f32 %v4358_v62, %v1143_v43  ;;  %v1794_v45 = vld [vmem:[%s4984_s5 + $0x48] sm:$0xff] }
 0x10b   : > { %v1144_v51 = vadd.f32 %v1080_v46, %v755_v48  ;;  %v916_v54 = vpop.permute.xlu0 %915  ;;  %v1278_v55 = vmax.f32 %v1214_v50, 0.0 }
 0x10c   : > { %v1081_v56 = vmul.f32 %v4347_v53, %v916_v54  ;;  %v559_v57 = vpop.permute.xlu1 %558  ;;  %1039 = vperm.xlu0 %3917, %v398_v49  }
 0x10d   : > { %v756_v58 = vmul.f32 %v4342_v52, %v559_v57  ;;  %713 = vperm.xlu1 %3920, %v398_v49   ;;  %3565 = vmatmul.mubr.f32.gmra.mxu0 %v1278_v55  ;;  %v1215_v60 = vadd.f32 %v4358_v62, %v1144_v51  ;;  %v1793_v51 = vld [vmem:[%s4984_s5 + $0x40] sm:$0xff] }
 0x10f   : > { %v1145_v61 = vadd.f32 %v1081_v56, %v756_v58  ;;  %v920_v63 = vpop.permute.xlu0 %919  ;;  %v1279_v0 = vmax.f32 %v1215_v60, 0.0  ;;  %v1792_v56 = vld [vmem:[%s4984_s5 + $0x38] sm:$0xff] }
 0x110   : > { %v1082_v1 = vmul.f32 %v4347_v53, %v920_v63  ;;  %v564_v2 = vpop.permute.xlu1 %563  ;;  %1043 = vperm.xlu0 %3917, %v399_v59   ;;  %v1791_v63 = vld [vmem:[%s4984_s5 + $0x30] sm:$0xff] }
 0x111   : > { %v757_v3 = vmul.f32 %v4342_v52, %v564_v2  ;;  %718 = vperm.xlu1 %3920, %v399_v59   ;;  %3567 = vmatprep.mubr.f32.mxu0 %v1279_v0  ;;  %v1216_v4 = vadd.f32 %v4358_v62, %v1145_v61  ;;  %v1790_v2 = vld [vmem:[%s4984_s5 + $0x28] sm:$0xff] }
 0x113   : > { %v924_v5 = vpop.permute.xlu0 %923  ;;  %v1280_v6 = vmax.f32 %v1216_v4, 0.0  ;;  %v1146_v7 = vadd.f32 %v1082_v1, %v757_v3 }
 0x114   : > { %v1083_v8 = vmul.f32 %v4347_v53, %v924_v5  ;;  %v569_v9 = vpop.permute.xlu1 %568 }
 0x115   : > { %v758_v10 = vmul.f32 %v4342_v52, %v569_v9  ;;  %3568 = vmatmul.mubr.f32.gmra.mxu0 %v1280_v6  ;;  %v1217_v11 = vadd.f32 %v4358_v62, %v1146_v7 }
 0x117   : > { %v1147_v12 = vadd.f32 %v1083_v8, %v758_v10  ;;  %v928_v13 = vpop.permute.xlu0 %927  ;;  %v1281_v14 = vmax.f32 %v1217_v11, 0.0  ;;  %v1789_v8 = vld [vmem:[%s4984_s5 + $0x20] sm:$0xff]  ;;  %v1788_v11 = vld [vmem:[%s4984_s5 + $0x18] sm:$0xff] }
 0x118   : > { %v1084_v16 = vmul.f32 %v4347_v53, %v928_v13  ;;  %v574_v17 = vpop.permute.xlu1 %573 }
 0x119   : > { %v759_v18 = vmul.f32 %v4342_v52, %v574_v17  ;;  %3570 = vmatprep.mubr.f32.mxu1 %v1281_v14  ;;  %v1218_v19 = vadd.f32 %v4358_v62, %v1147_v12 }
 0x11b   : > { %v1148_v20 = vadd.f32 %v1084_v16, %v759_v18  ;;  %v932_v21 = vpop.permute.xlu0 %931  ;;  %v1282_v22 = vmax.f32 %v1218_v19, 0.0  ;;  %v1787_v18 = vld [vmem:[%s4984_s5 + $0x10] sm:$0xff] }
 0x11c   : > { %v1085_v23 = vmul.f32 %v4347_v53, %v932_v21  ;;  %v579_v24 = vpop.permute.xlu1 %578  ;;  %v1786_v21 = vld [vmem:[%s4984_s5 + $0x8] sm:$0xff] }
 0x11d   : > { %v760_v26 = vmul.f32 %v4342_v52, %v579_v24  ;;  %3571 = vmatmul.mubr.f32.vlgmr.msra.gmra.mxu1 %v1282_v22  ;;  %v1219_v27 = vadd.f32 %v4358_v62, %v1148_v20 }
 0x11e   : > { %3619 = vmatpush3.msra.mxu1 %v4461_v15 }
 0x11f   : > { %v1149_v29 = vadd.f32 %v1085_v23, %v760_v26  ;;  %v936_v30 = vpop.permute.xlu0 %935  ;;  %v1283_v31 = vmax.f32 %v1219_v27, 0.0  ;;  %3620 = vmatprep.subr.mxu1 %v1799_v25  ;;  %v1785_v27 = vld [vmem:[%s4984_s5] sm:$0xff] }
 0x120   : > { %v1086_v32 = vmul.f32 %v4347_v53, %v936_v30  ;;  %v584_v33 = vpop.permute.xlu1 %583  ;;  %3621 = vmatpush3.msra.mxu1 %v1799_v25 }
 0x121   : > { %v761_v35 = vmul.f32 %v4342_v52, %v584_v33  ;;  %3573 = vmatprep.mubr.f32.mxu1 %v1283_v31  ;;  %v1220_v15 = vadd.f32 %v4358_v62, %v1149_v29  ;;  %3622 = vmatprep.subr.mxu1 %v1798_v28 }
 0x122   : > { %3623 = vmatpush3.msra.mxu1 %v1798_v28 }
 0x123   : > { %v1150_v37 = vadd.f32 %v1086_v32, %v761_v35  ;;  %v940_v38 = vpop.permute.xlu0 %939  ;;  %v1284_v39 = vmax.f32 %v1220_v15, 0.0  ;;  %3624 = vmatprep.subr.mxu1 %v1797_v34 }
 0x124   : > { %v1087_v40 = vmul.f32 %v4347_v53, %v940_v38  ;;  %v589_v41 = vpop.permute.xlu1 %588  ;;  %3625 = vmatpush3.msra.mxu1 %v1797_v34 }
 0x125   : > { %v762_v43 = vmul.f32 %v4342_v52, %v589_v41  ;;  %3574 = vmatmul.mubr.f32.gmra.mxu1 %v1284_v39  ;;  %v1221_v44 = vadd.f32 %v4358_v62, %v1150_v37  ;;  %3626 = vmatprep.subr.mxu1 %v1796_v36 }
 0x126   : > { %3627 = vmatpush3.msra.mxu1 %v1796_v36 }
 0x127   : > { %v1151_v46 = vadd.f32 %v1087_v40, %v762_v43  ;;  %v944_v47 = vpop.permute.xlu0 %943  ;;  %v1285_v48 = vmax.f32 %v1221_v44, 0.0  ;;  %3628 = vmatprep.subr.mxu1 %v1795_v42 }
 0x128   : > { %v1088_v49 = vmul.f32 %v4347_v53, %v944_v47  ;;  %v594_v50 = vpop.permute.xlu1 %593  ;;  %3629 = vmatpush3.msra.mxu1 %v1795_v42 }
 0x129   : > { %v763_v54 = vmul.f32 %v4342_v52, %v594_v50  ;;  %3576 = vmatprep.mubr.f32.mxu1 %v1285_v48  ;;  %v1222_v55 = vadd.f32 %v4358_v62, %v1151_v46  ;;  %3630 = vmatprep.subr.mxu1 %v1794_v45 }
 0x12a   : > { %3631 = vmatpush3.msra.mxu1 %v1794_v45 }
 0x12b   : > { %v1152_v57 = vadd.f32 %v1088_v49, %v763_v54  ;;  %v948_v58 = vpop.permute.xlu0 %947  ;;  %v1286_v59 = vmax.f32 %v1222_v55, 0.0  ;;  %3632 = vmatprep.subr.mxu1 %v1793_v51 }
 0x12c   : > { %v1089_v60 = vmul.f32 %v4347_v53, %v948_v58  ;;  %v599_v61 = vpop.permute.xlu1 %598  ;;  %3633 = vmatpush3.msra.mxu1 %v1793_v51 }
 0x12d   : > { %v764_v0 = vmul.f32 %v4342_v52, %v599_v61  ;;  %3577 = vmatmul.mubr.f32.gmra.mxu1 %v1286_v59  ;;  %v1223_v1 = vadd.f32 %v4358_v62, %v1152_v57  ;;  %3634 = vmatprep.subr.mxu1 %v1792_v56  ;;  %v4579_v57 = vld [vmem:[%s4980_s1] ss:$0 sm:$0xff] }
 0x12e   : > { %3635 = vmatpush3.msra.mxu1 %v1792_v56 }
 0x12f   : > { %v1153_v3 = vadd.f32 %v1089_v60, %v764_v0  ;;  %v952_v4 = vpop.permute.xlu0 %951  ;;  %v1287_v5 = vmax.f32 %v1223_v1, 0.0  ;;  %3636 = vmatprep.subr.mxu1 %v1791_v63 }
 0x130   : > { %v1090_v6 = vmul.f32 %v4347_v53, %v952_v4  ;;  %v604_v7 = vpop.permute.xlu1 %603  ;;  %3637 = vmatpush3.msra.mxu1 %v1791_v63  ;;  %v4586_v63 = vld [vmem:[%s4980_s1 + $0x1] ss:$0 sm:$0xff] }
 0x131   : > { %v765_v9 = vmul.f32 %v4342_v52, %v604_v7  ;;  %3579 = vmatprep.mubr.f32.mxu1 %v1287_v5  ;;  %v1224_v10 = vadd.f32 %v4358_v62, %v1153_v3  ;;  %3638 = vmatprep.subr.mxu1 %v1790_v2 }
 0x132   : > { %3639 = vmatpush3.msra.mxu1 %v1790_v2 }
 0x133   : > { %v1154_v12 = vadd.f32 %v1090_v6, %v765_v9  ;;  %v956_v13 = vpop.permute.xlu0 %955  ;;  %v1288_v14 = vmax.f32 %v1224_v10, 0.0  ;;  %3640 = vmatprep.subr.mxu1 %v1789_v8  ;;  %v4596_v9 = vld [vmem:[%s4981_s2] ss:$0 sm:$0xff] }
 0x134   : > { %v1091_v16 = vmul.f32 %v4347_v53, %v956_v13  ;;  %v609_v17 = vpop.permute.xlu1 %608  ;;  %3641 = vmatpush3.msra.mxu1 %v1789_v8 }
 0x135   : > { %v766_v19 = vmul.f32 %v4342_v52, %v609_v17  ;;  %3580 = vmatmul.mubr.f32.gmra.mxu1 %v1288_v14  ;;  %v1225_v20 = vadd.f32 %v4358_v62, %v1154_v12  ;;  %3642 = vmatprep.subr.mxu1 %v1788_v11 }
 0x136   : > { %3643 = vmatpush3.msra.mxu1 %v1788_v11 }
 0x137   : > { %v1155_v22 = vadd.f32 %v1091_v16, %v766_v19  ;;  %v960_v23 = vpop.permute.xlu0 %959  ;;  %v1289_v24 = vmax.f32 %v1225_v20, 0.0  ;;  %3644 = vmatprep.subr.mxu1 %v1787_v18 }
 0x138   : > { %v1092_v25 = vmul.f32 %v4347_v53, %v960_v23  ;;  %v614_v26 = vpop.permute.xlu1 %613  ;;  %3645 = vmatpush3.msra.mxu1 %v1787_v18 }
 0x139   : > { %v767_v28 = vmul.f32 %v4342_v52, %v614_v26  ;;  %3582 = vmatprep.mubr.f32.mxu1 %v1289_v24  ;;  %v1226_v29 = vadd.f32 %v4358_v62, %v1155_v22  ;;  %3646 = vmatprep.subr.mxu1 %v1786_v21 }
 0x13a   : > { %3647 = vmatpush3.msra.mxu1 %v1786_v21 }
 0x13b   : > { %v1156_v30 = vadd.f32 %v1092_v25, %v767_v28  ;;  %v964_v31 = vpop.permute.xlu0 %963  ;;  %v1290_v32 = vmax.f32 %v1226_v29, 0.0  ;;  %3648 = vmatprep.subr.mxu1 %v1785_v27 }
 0x13c   : > { %v1093_v33 = vmul.f32 %v4347_v53, %v964_v31  ;;  %v619_v34 = vpop.permute.xlu1 %618  ;;  %3649 = vmatpush3.msra.mxu1 %v1785_v27 }
 0x13d   : > { %v768_v35 = vmul.f32 %v4342_v52, %v619_v34  ;;  %3583 = vmatmul.mubr.f32.gmra.mxu1 %v1290_v32  ;;  %v1227_v15 = vadd.f32 %v4358_v62, %v1156_v30 }
 0x13f   : > { %v1157_v36 = vadd.f32 %v1093_v33, %v768_v35  ;;  %v968_v37 = vpop.permute.xlu0 %967  ;;  %v1291_v38 = vmax.f32 %v1227_v15, 0.0 }
 0x140   : > { %v1094_v39 = vmul.f32 %v4347_v53, %v968_v37  ;;  %v624_v40 = vpop.permute.xlu1 %623 }
 0x141   : > { %v769_v41 = vmul.f32 %v4342_v52, %v624_v40  ;;  %3585 = vmatprep.mubr.f32.mxu1 %v1291_v38  ;;  %v1228_v42 = vadd.f32 %v4358_v62, %v1157_v36 }
 0x143   : > { %v1158_v43 = vadd.f32 %v1094_v39, %v769_v41  ;;  %v972_v44 = vpop.permute.xlu0 %971  ;;  %v1292_v45 = vmax.f32 %v1228_v42, 0.0 }
 0x144   : > { %v1095_v46 = vmul.f32 %v4347_v53, %v972_v44  ;;  %v629_v47 = vpop.permute.xlu1 %628 }
 0x145   : > { %v770_v48 = vmul.f32 %v4342_v52, %v629_v47  ;;  %3586 = vmatmul.mubr.f32.gmra.mxu1 %v1292_v45  ;;  %v1229_v49 = vadd.f32 %v4358_v62, %v1158_v43 }
 0x147   : > { %v1159_v50 = vadd.f32 %v1095_v46, %v770_v48  ;;  %v976_v51 = vpop.permute.xlu0 %975  ;;  %v1293_v54 = vmax.f32 %v1229_v49, 0.0 }
 0x148   : > { %v1096_v55 = vmul.f32 %v4347_v53, %v976_v51  ;;  %v634_v56 = vpop.permute.xlu1 %633 }
 0x149   : > { %v771_v58 = vmul.f32 %v4579_v57, %v634_v56  ;;  %3588 = vmatprep.mubr.f32.mxu1 %v1293_v54  ;;  %v1230_v59 = vadd.f32 %v4358_v62, %v1159_v50 }
 0x14b   : > { %v1160_v52 = vadd.f32 %v1096_v55, %v771_v58  ;;  %v980_v60 = vpop.permute.xlu0 %979  ;;  %v1294_v61 = vmax.f32 %v1230_v59, 0.0 }
 0x14c   : > { %v1097_v53 = vmul.f32 %v4586_v63, %v980_v60  ;;  %v639_v0 = vpop.permute.xlu1 %638 }
 0x14d   : > { %v772_v1 = vmul.f32 %v4579_v57, %v639_v0  ;;  %3589 = vmatmul.mubr.f32.gmra.mxu1 %v1294_v61  ;;  %v1231_v2 = vadd.f32 %v4358_v62, %v1160_v52 }
 0x14f   : > { %v1161_v3 = vadd.f32 %v1097_v53, %v772_v1  ;;  %v984_v4 = vpop.permute.xlu0 %983  ;;  %v1295_v5 = vmax.f32 %v1231_v2, 0.0 }
 0x150   : > { %v1098_v6 = vmul.f32 %v4586_v63, %v984_v4  ;;  %v644_v7 = vpop.permute.xlu1 %643 }
 0x151   : > { %v773_v8 = vmul.f32 %v4579_v57, %v644_v7  ;;  %3591 = vmatprep.mubr.f32.mxu1 %v1295_v5  ;;  %v1232_v10 = vadd.f32 %v4596_v9, %v1161_v3 }
 0x153   : > { %v1162_v11 = vadd.f32 %v1098_v6, %v773_v8  ;;  %v988_v12 = vpop.permute.xlu0 %987  ;;  %v1296_v13 = vmax.f32 %v1232_v10, 0.0 }
 0x154   : > { %v1099_v62 = vmul.f32 %v4586_v63, %v988_v12  ;;  %v649_v14 = vpop.permute.xlu1 %648 }
 0x155   : > { %v774_v16 = vmul.f32 %v4579_v57, %v649_v14  ;;  %3592 = vmatmul.mubr.f32.gmra.mxu1 %v1296_v13  ;;  %v1233_v17 = vadd.f32 %v4596_v9, %v1162_v11 }
 0x157   : > { %v1163_v18 = vadd.f32 %v1099_v62, %v774_v16  ;;  %v992_v19 = vpop.permute.xlu0 %991  ;;  %v1297_v20 = vmax.f32 %v1233_v17, 0.0 }
 0x158   : > { %v1100_v21 = vmul.f32 %v4586_v63, %v992_v19  ;;  %v654_v22 = vpop.permute.xlu1 %653 }
 0x159   : > { %v775_v23 = vmul.f32 %v4579_v57, %v654_v22  ;;  %3594 = vmatprep.mubr.f32.mxu1 %v1297_v20  ;;  %v1234_v24 = vadd.f32 %v4596_v9, %v1163_v18 }
 0x15b   : > { %v1164_v25 = vadd.f32 %v1100_v21, %v775_v23  ;;  %v996_v26 = vpop.permute.xlu0 %995  ;;  %v1298_v27 = vmax.f32 %v1234_v24, 0.0 }
 0x15c   : > { %v1101_v28 = vmul.f32 %v4586_v63, %v996_v26  ;;  %v659_v29 = vpop.permute.xlu1 %658 }
 0x15d   : > { %v776_v30 = vmul.f32 %v4579_v57, %v659_v29  ;;  %3595 = vmatmul.mubr.f32.gmra.mxu1 %v1298_v27  ;;  %v1235_v31 = vadd.f32 %v4596_v9, %v1164_v25  ;;  %v4623_v5 = vpop.f32.mrf.mxu0 }
 0x15f   : > { %v1165_v32 = vadd.f32 %v1101_v28, %v776_v30  ;;  %v1000_v33 = vpop.permute.xlu0 %999  ;;  %v1299_v34 = vmax.f32 %v1235_v31, 0.0  ;;  %v1402_v62 = vpop.f32.mrf.mxu0 }
 0x160   : > { %v1102_v35 = vmul.f32 %v4586_v63, %v1000_v33  ;;  %v664_v15 = vpop.permute.xlu1 %663 }
 0x161   : > { %v777_v36 = vmul.f32 %v4579_v57, %v664_v15  ;;  %3597 = vmatprep.mubr.f32.mxu1 %v1299_v34  ;;  %v1236_v37 = vadd.f32 %v4596_v9, %v1165_v32 }
 0x163   : > { %v1166_v38 = vadd.f32 %v1102_v35, %v777_v36  ;;  %v1004_v39 = vpop.permute.xlu0 %1003  ;;  %v1300_v40 = vmax.f32 %v1236_v37, 0.0 }
 0x164   : > { %v1103_v41 = vmul.f32 %v4586_v63, %v1004_v39  ;;  %v669_v42 = vpop.permute.xlu1 %668 }
 0x165   : > { %v778_v43 = vmul.f32 %v4579_v57, %v669_v42  ;;  %3598 = vmatmul.mubr.f32.gmra.mxu1 %v1300_v40  ;;  %v1237_v44 = vadd.f32 %v4596_v9, %v1166_v38  ;;  %v4629_v20 = vpop.f32.mrf.mxu0 }
 0x167   : > { %v1167_v45 = vadd.f32 %v1103_v41, %v778_v43  ;;  %v1008_v46 = vpop.permute.xlu0 %1007  ;;  %v1301_v47 = vmax.f32 %v1237_v44, 0.0  ;;  %v1412_v28 = vpop.f32.mrf.mxu0 }
 0x168   : > { %v1104_v48 = vmul.f32 %v4586_v63, %v1008_v46  ;;  %v674_v49 = vpop.permute.xlu1 %673 }
 0x169   : > { %v779_v50 = vmul.f32 %v4579_v57, %v674_v49  ;;  %3600 = vmatprep.mubr.f32.mxu1 %v1301_v47  ;;  %v1238_v51 = vadd.f32 %v4596_v9, %v1167_v45 }
 0x16b   : > { %v1168_v54 = vadd.f32 %v1104_v48, %v779_v50  ;;  %v1012_v55 = vpop.permute.xlu0 %1011  ;;  %v1302_v56 = vmax.f32 %v1238_v51, 0.0 }
 0x16c   : > { %v1105_v58 = vmul.f32 %v4586_v63, %v1012_v55  ;;  %v679_v59 = vpop.permute.xlu1 %678 }
 0x16d   : > { %v780_v52 = vmul.f32 %v4579_v57, %v679_v59  ;;  %3601 = vmatmul.mubr.f32.gmra.mxu1 %v1302_v56  ;;  %v1239_v60 = vadd.f32 %v4596_v9, %v1168_v54  ;;  %v3530_v31 = vpop.f32.mrf.mxu0 }
 0x16f   : > { %v1169_v61 = vadd.f32 %v1105_v58, %v780_v52  ;;  %v1016_v53 = vpop.permute.xlu0 %1015  ;;  %v1303_v0 = vmax.f32 %v1239_v60, 0.0  ;;  %v1422_v38 = vpop.f32.mrf.mxu0 }
 0x170   : > { %v1106_v1 = vmul.f32 %v4586_v63, %v1016_v53  ;;  %v684_v2 = vpop.permute.xlu1 %683 }
 0x171   : > { %v781_v3 = vmul.f32 %v4579_v57, %v684_v2  ;;  %3603 = vmatprep.mubr.f32.mxu1 %v1303_v0  ;;  %v1240_v4 = vadd.f32 %v4596_v9, %v1169_v61  ;;  %v4651_v2 = vld [vmem:[%s4983_s4] ss:$0 sm:$0xff] }
 0x173   : > { %v1170_v6 = vadd.f32 %v1106_v1, %v781_v3  ;;  %v1020_v7 = vpop.permute.xlu0 %1019  ;;  %v1304_v8 = vmax.f32 %v1240_v4, 0.0 }
 0x174   : > { %v1107_v10 = vmul.f32 %v4586_v63, %v1020_v7  ;;  %v689_v11 = vpop.permute.xlu1 %688  ;;  %v1403_v7 = vadd.f32 %v4651_v2, %v1402_v62 }
 0x175   : > { %v782_v12 = vmul.f32 %v4579_v57, %v689_v11  ;;  %3604 = vmatmul.mubr.f32.gmra.mxu1 %v1304_v8  ;;  %v1241_v13 = vadd.f32 %v4596_v9, %v1170_v6  ;;  %v3533_v44 = vpop.f32.mrf.mxu0 }
 0x176   : > { %v1721_v11 = vmax.f32 %v1403_v7, 0.0 }
 0x177   : > { %v1171_v14 = vadd.f32 %v1107_v10, %v782_v12  ;;  %v1024_v16 = vpop.permute.xlu0 %1023  ;;  %v1305_v17 = vmax.f32 %v1241_v13, 0.0  ;;  %v1432_v54 = vpop.f32.mrf.mxu0  ;;  %v1413_v12 = vadd.f32 %v4651_v2, %v1412_v28 }
 0x178   : > { %v1108_v18 = vmul.f32 %v4586_v63, %v1024_v16  ;;  %v694_v19 = vpop.permute.xlu1 %693  ;;  %v1418_v16 = vadd.f32 %v4629_v20, %v4651_v2 }
 0x179   : > { %v783_v21 = vmul.f32 %v4579_v57, %v694_v19  ;;  %3606 = vmatprep.mubr.f32.mxu1 %v1305_v17  ;;  %v1242_v22 = vadd.f32 %v4596_v9, %v1171_v14  ;;  %v1723_v62 = vmax.f32 %v1413_v12, 0.0 }
 0x17b   : > { %v1172_v23 = vadd.f32 %v1108_v18, %v783_v21  ;;  %v1028_v24 = vpop.permute.xlu0 %1027  ;;  %v1306_v25 = vmax.f32 %v1242_v22, 0.0  ;;  %v1423_v18 = vadd.f32 %v4651_v2, %v1422_v38  ;;  %v1433_v22 = vadd.f32 %v4651_v2, %v1432_v54 }
 0x17c   : > { %v1109_v26 = vmul.f32 %v4586_v63, %v1028_v24  ;;  %v699_v27 = vpop.permute.xlu1 %698 }
 0x17d   : > { %v784_v29 = vmul.f32 %v4579_v57, %v699_v27  ;;  %3607 = vmatmul.mubr.f32.gmra.mxu1 %v1306_v25  ;;  %v1243_v30 = vadd.f32 %v4596_v9, %v1172_v23  ;;  %v3536_v58 = vpop.f32.mrf.mxu0  ;;  %v1725_v21 = vmax.f32 %v1423_v18, 0.0  ;;  %v1438_v25 = vadd.f32 %v3533_v44, %v4651_v2 }
 0x17e   : > { %v1727_v20 = vmax.f32 %v1433_v22, 0.0  ;;  %v2267_v22 = vld [vmem:[%s4986_s7 + $0x50] sm:$0xff] }
 0x17f   : > { %v1173_v32 = vadd.f32 %v1109_v26, %v784_v29  ;;  %v1032_v33 = vpop.permute.xlu0 %1031  ;;  %v1307_v34 = vmax.f32 %v1243_v30, 0.0  ;;  %v1442_v3 = vpop.f32.mrf.mxu0  ;;  %v1728_v28 = vmax.f32 %v1438_v25, 0.0  ;;  %v1448_v29 = vadd.f32 %v3536_v58, %v4651_v2 }
 0x180   : > { %v1110_v35 = vmul.f32 %v4586_v63, %v1032_v33  ;;  %v704_v15 = vpop.permute.xlu1 %703  ;;  %v1443_v26 = vadd.f32 %v4651_v2, %v1442_v3 }
 0x181   : > { %v785_v36 = vmul.f32 %v4579_v57, %v704_v15  ;;  %3609 = vmatprep.mubr.f32.mxu1 %v1307_v34  ;;  %v1244_v37 = vadd.f32 %v4596_v9, %v1173_v32  ;;  %v1730_v33 = vmax.f32 %v1448_v29, 0.0  ;;  %v2264_v29 = vld [vmem:[%s4986_s7 + $0x38] sm:$0xff] }
 0x183   : > { %v1174_v39 = vadd.f32 %v1110_v35, %v785_v36  ;;  %v1036_v40 = vpop.permute.xlu0 %1035  ;;  %v1308_v41 = vmax.f32 %v1244_v37, 0.0 }
 0x184   : > { %v1111_v42 = vmul.f32 %v4586_v63, %v1036_v40  ;;  %v709_v43 = vpop.permute.xlu1 %708 }
 0x185   : > { %v786_v45 = vmul.f32 %v4579_v57, %v709_v43  ;;  %3610 = vmatmul.mubr.f32.gmra.mxu1 %v1308_v41  ;;  %v1245_v46 = vadd.f32 %v4596_v9, %v1174_v39  ;;  %v3539_v8 = vpop.f32.mrf.mxu0 }
 0x186   : > { %v1458_v34 = vadd.f32 %v3539_v8, %v4651_v2 }
 0x187   : > { %v1175_v47 = vadd.f32 %v1111_v42, %v786_v45  ;;  %v1040_v48 = vpop.permute.xlu0 %1039  ;;  %v1309_v49 = vmax.f32 %v1245_v46, 0.0  ;;  %v1452_v13 = vpop.f32.mrf.mxu0 }
 0x188   : > { %v1112_v50 = vmul.f32 %v4586_v63, %v1040_v48  ;;  %v714_v51 = vpop.permute.xlu1 %713  ;;  %v1453_v32 = vadd.f32 %v4651_v2, %v1452_v13  ;;  %v1732_v38 = vmax.f32 %v1458_v34, 0.0 }
 0x189   : > { %v787_v55 = vmul.f32 %v4579_v57, %v714_v51  ;;  %3612 = vmatprep.mubr.f32.mxu1 %v1309_v49  ;;  %v1246_v56 = vadd.f32 %v4596_v9, %v1175_v47 }
 0x18a   : > { %v1731_v15 = vmax.f32 %v1453_v32, 0.0 }
 0x18b   : > { %v1176_v59 = vadd.f32 %v1112_v50, %v787_v55  ;;  %v1044_v52 = vpop.permute.xlu0 %1043  ;;  %v1310_v60 = vmax.f32 %v1246_v56, 0.0 }
 0x18c   : > { %v1113_v61 = vmul.f32 %v4586_v63, %v1044_v52  ;;  %v719_v53 = vpop.permute.xlu1 %718 }
 0x18d   : > { %v788_v0 = vmul.f32 %v4579_v57, %v719_v53  ;;  %3613 = vmatmul.mubr.f32.gmra.mxu1 %v1310_v60  ;;  %v1247_v1 = vadd.f32 %v4596_v9, %v1176_v59  ;;  %v1408_v57 = vadd.f32 %v4623_v5, %v4651_v2  ;;  %v3542_v17 = vpop.f32.mrf.mxu0  ;;  %v1428_v5 = vadd.f32 %v3530_v31, %v4651_v2 }
 0x18e   : > { %v1729_v31 = vmax.f32 %v1443_v26, 0.0  ;;  %v1468_v39 = vadd.f32 %v3542_v17, %v4651_v2  ;;  %v2269_v17 = vld [vmem:[%s4986_s7 + $0x60] sm:$0xff] }
 0x18f   : > { %v1177_v4 = vadd.f32 %v1113_v61, %v788_v0  ;;  %v1311_v6 = vmax.f32 %v1247_v1, 0.0  ;;  %v1722_v14 = vmax.f32 %v1408_v57, 0.0  ;;  %v1462_v19 = vpop.f32.mrf.mxu0  ;;  %v1726_v24 = vmax.f32 %v1428_v5, 0.0  ;;  %v2272_v57 = vld [vmem:[%s4986_s7 + $0x78] sm:$0xff] }
 0x190   : > { %v1463_v36 = vadd.f32 %v4651_v2, %v1462_v19  ;;  %v1734_v43 = vmax.f32 %v1468_v39, 0.0  ;;  %3746 = vmatprep.subr.mxu0 %v2272_v57  ;;  %v2268_v19 = vld [vmem:[%s4986_s7 + $0x58] sm:$0xff] }
 0x191   : > { %3615 = vmatprep.mubr.f32.mxu1 %v1311_v6  ;;  %v1248_v63 = vadd.f32 %v4596_v9, %v1177_v4  ;;  %v1724_v9 = vmax.f32 %v1418_v16, 0.0  ;;  %3747 = vmatpush3.msra.mxu0 %v2272_v57 }
 0x192   : > { %v1733_v40 = vmax.f32 %v1463_v36, 0.0 }
 0x193   : > { %v1312_v10 = vmax.f32 %v1248_v63, 0.0 }
 0x195   : > { %3616 = vmatmul.mubr.f32.gmra.mxu1 %v1312_v10  ;;  %v3545_v23 = vpop.f32.mrf.mxu0  ;;  %v2271_v10 = vld [vmem:[%s4986_s7 + $0x70] sm:$0xff] }
 0x196   : > { %3650 = vmatprep.mubr.f32.mxu1 %v1721_v11  ;;  %v1478_v44 = vadd.f32 %v3545_v23, %v4651_v2  ;;  %3748 = vmatprep.subr.mxu0 %v2271_v10 }
 0x197   : > { %v1472_v27 = vpop.f32.mrf.mxu0  ;;  %3749 = vmatpush3.msra.mxu0 %v2271_v10 }
 0x198   : > { %v1473_v41 = vadd.f32 %v4651_v2, %v1472_v27  ;;  %v1736_v48 = vmax.f32 %v1478_v44, 0.0  ;;  %v2257_v44 = vld [vmem:[%s4986_s7] sm:$0xff] }
 0x199   : > { %3651 = vmatmul.mubr.f32.vlgmr.msra.gmra.mxu1 %v1722_v14  ;;  %v2270_v14 = vld [vmem:[%s4986_s7 + $0x68] sm:$0xff] }
 0x19a   : > { %3653 = vmatprep.mubr.f32.mxu1 %v1723_v62  ;;  %v1735_v46 = vmax.f32 %v1473_v41, 0.0  ;;  %3750 = vmatprep.subr.mxu0 %v2270_v14 }
 0x19b   : > { %3751 = vmatpush3.msra.mxu0 %v2270_v14 }
 0x19c   : > { %3752 = vmatprep.subr.mxu0 %v2269_v17 }
 0x19d   : > { %3654 = vmatmul.mubr.f32.gmra.mxu1 %v1724_v9  ;;  %v3548_v30 = vpop.f32.mrf.mxu0  ;;  %3753 = vmatpush3.msra.mxu0 %v2269_v17 }
 0x19e   : > { %3656 = vmatprep.mubr.f32.mxu1 %v1725_v21  ;;  %v1488_v49 = vadd.f32 %v3548_v30, %v4651_v2  ;;  %3754 = vmatprep.subr.mxu0 %v2268_v19 }
 0x19f   : > { %v1482_v35 = vpop.f32.mrf.mxu0  ;;  %3755 = vmatpush3.msra.mxu0 %v2268_v19 }
 0x1a0   : > { %v1483_v47 = vadd.f32 %v4651_v2, %v1482_v35  ;;  %v1738_v56 = vmax.f32 %v1488_v49, 0.0  ;;  %3756 = vmatprep.subr.mxu0 %v2267_v22  ;;  %v2261_v35 = vld [vmem:[%s4986_s7 + $0x20] sm:$0xff] }
 0x1a1   : > { %3657 = vmatmul.mubr.f32.gmra.mxu1 %v1726_v24  ;;  %3757 = vmatpush3.msra.mxu0 %v2267_v22  ;;  %v2266_v24 = vld [vmem:[%s4986_s7 + $0x48] sm:$0xff] }
 0x1a2   : > { %3659 = vmatprep.mubr.f32.mxu1 %v1727_v20  ;;  %v1737_v51 = vmax.f32 %v1483_v47, 0.0  ;;  %3758 = vmatprep.subr.mxu0 %v2266_v24  ;;  %v2265_v20 = vld [vmem:[%s4986_s7 + $0x40] sm:$0xff] }
 0x1a3   : > { %3759 = vmatpush3.msra.mxu0 %v2266_v24 }
 0x1a4   : > { %3760 = vmatprep.subr.mxu0 %v2265_v20 }
 0x1a5   : > { %3660 = vmatmul.mubr.f32.gmra.mxu1 %v1728_v28  ;;  %v3551_v37 = vpop.f32.mrf.mxu0  ;;  %3761 = vmatpush3.msra.mxu0 %v2265_v20 }
 0x1a6   : > { %3662 = vmatprep.mubr.f32.mxu1 %v1729_v31  ;;  %v1498_v58 = vadd.f32 %v3551_v37, %v4651_v2  ;;  %3762 = vmatprep.subr.mxu0 %v2264_v29  ;;  %v2263_v31 = vld [vmem:[%s4986_s7 + $0x30] sm:$0xff] }
 0x1a7   : > { %v1492_v42 = vpop.f32.mrf.mxu0  ;;  %3763 = vmatpush3.msra.mxu0 %v2264_v29 }
 0x1a8   : > { %v1493_v54 = vadd.f32 %v4651_v2, %v1492_v42  ;;  %v1740_v61 = vmax.f32 %v1498_v58, 0.0  ;;  %3764 = vmatprep.subr.mxu0 %v2263_v31  ;;  %v2258_v42 = vld [vmem:[%s4986_s7 + $0x8] sm:$0xff] }
 0x1a9   : > { %3663 = vmatmul.mubr.f32.gmra.mxu1 %v1730_v33  ;;  %3765 = vmatpush3.msra.mxu0 %v2263_v31  ;;  %v2262_v33 = vld [vmem:[%s4986_s7 + $0x28] sm:$0xff] }
 0x1aa   : > { %3665 = vmatprep.mubr.f32.mxu1 %v1731_v15  ;;  %v1739_v59 = vmax.f32 %v1493_v54, 0.0  ;;  %3766 = vmatprep.subr.mxu0 %v2262_v33 }
 0x1ab   : > { %3767 = vmatpush3.msra.mxu0 %v2262_v33 }
 0x1ac   : > { %3768 = vmatprep.subr.mxu0 %v2261_v35 }
 0x1ad   : > { %3666 = vmatmul.mubr.f32.gmra.mxu1 %v1732_v38  ;;  %v3554_v45 = vpop.f32.mrf.mxu0  ;;  %3769 = vmatpush3.msra.mxu0 %v2261_v35  ;;  %v2260_v38 = vld [vmem:[%s4986_s7 + $0x18] sm:$0xff] }
 0x1ae   : > { %3668 = vmatprep.mubr.f32.mxu1 %v1733_v40  ;;  %v1508_v53 = vadd.f32 %v3554_v45, %v4651_v2  ;;  %3770 = vmatprep.subr.mxu0 %v2260_v38  ;;  %v2259_v40 = vld [vmem:[%s4986_s7 + $0x10] sm:$0xff] }
 0x1af   : > { %v1502_v50 = vpop.f32.mrf.mxu0  ;;  %3771 = vmatpush3.msra.mxu0 %v2260_v38 }
 0x1b0   : > { %v1503_v52 = vadd.f32 %v4651_v2, %v1502_v50  ;;  %v1742_v4 = vmax.f32 %v1508_v53, 0.0  ;;  %3772 = vmatprep.subr.mxu0 %v2259_v40 }
 0x1b1   : > { %3669 = vmatmul.mubr.f32.gmra.mxu1 %v1734_v43  ;;  %3773 = vmatpush3.msra.mxu0 %v2259_v40 }
 0x1b2   : > { %3671 = vmatprep.mubr.f32.mxu1 %v1735_v46  ;;  %v1741_v0 = vmax.f32 %v1503_v52, 0.0  ;;  %3774 = vmatprep.subr.mxu0 %v2258_v42 }
 0x1b3   : > { %3775 = vmatpush3.msra.mxu0 %v2258_v42 }
 0x1b4   : > { %3776 = vmatprep.subr.mxu0 %v2257_v44 }
 0x1b5   : > { %v3557_v55 = vpop.f32.mrf.mxu0  ;;  %3672 = vmatmul.mubr.f32.gmra.mxu1 %v1736_v48  ;;  %3777 = vmatpush3.msra.mxu0 %v2257_v44 }
 0x1b6   : > { %3674 = vmatprep.mubr.f32.mxu1 %v1737_v51  ;;  %v1518_v6 = vadd.f32 %v3557_v55, %v4651_v2 }
 0x1b7   : > { %v1512_v60 = vpop.f32.mrf.mxu0 }
 0x1b8   : > { %v1513_v1 = vadd.f32 %v4651_v2, %v1512_v60  ;;  %v1744_v11 = vmax.f32 %v1518_v6, 0.0 }
 0x1b9   : > { %3675 = vmatmul.mubr.f32.gmra.mxu1 %v1738_v56 }
 0x1ba   : > { %3677 = vmatprep.mubr.f32.mxu1 %v1739_v59  ;;  %v1743_v8 = vmax.f32 %v1513_v1, 0.0 }
 0x1bd   : > { %v3560_v3 = vpop.f32.mrf.mxu0  ;;  %3678 = vmatmul.mubr.f32.gmra.mxu1 %v1740_v61 }
 0x1be   : > { %3680 = vmatprep.mubr.f32.mxu1 %v1741_v0  ;;  %v1528_v12 = vadd.f32 %v3560_v3, %v4651_v2 }
 0x1bf   : > { %v1522_v7 = vpop.f32.mrf.mxu0 }
 0x1c0   : > { %v1523_v63 = vadd.f32 %v4651_v2, %v1522_v7  ;;  %v1746_v62 = vmax.f32 %v1528_v12, 0.0 }
 0x1c1   : > { %3681 = vmatmul.mubr.f32.gmra.mxu1 %v1742_v4 }
 0x1c2   : > { %3683 = vmatprep.mubr.f32.mxu1 %v1743_v8  ;;  %v1745_v13 = vmax.f32 %v1523_v63, 0.0 }
 0x1c5   : > { %v3563_v16 = vpop.f32.mrf.mxu0  ;;  %3684 = vmatmul.mubr.f32.gmra.mxu1 %v1744_v11 }
 0x1c6   : > { %3686 = vmatprep.mubr.f32.mxu1 %v1745_v13  ;;  %v1538_v18 = vadd.f32 %v3563_v16, %v4651_v2 }
 0x1c7   : > { %v1532_v9 = vpop.f32.mrf.mxu0 }
 0x1c8   : > { %v1533_v5 = vadd.f32 %v4651_v2, %v1532_v9  ;;  %v1748_v23 = vmax.f32 %v1538_v18, 0.0 }
 0x1c9   : > { %3687 = vmatmul.mubr.f32.gmra.mxu1 %v1746_v62 }
 0x1ca   : > { %v1747_v21 = vmax.f32 %v1533_v5, 0.0 }
 0x1cc   : > { %3689 = vmatprep.mubr.f32.mxu1 %v1747_v21 }
 0x1cd   : > { %v3566_v25 = vpop.f32.mrf.mxu0  ;;  %3690 = vmatmul.mubr.f32.gmra.mxu1 %v1748_v23 }
 0x1ce   : > { %v1548_v26 = vadd.f32 %v3566_v25, %v4651_v2 }
 0x1cf   : > { %v1542_v27 = vpop.f32.mrf.mxu0 }
 0x1d0   : > { %v1543_v28 = vadd.f32 %v4651_v2, %v1542_v27  ;;  %v1750_v32 = vmax.f32 %v1548_v26, 0.0 }
 0x1d2   : > { %v1749_v30 = vmax.f32 %v1543_v28, 0.0 }
 0x1d4   : > { %3692 = vmatprep.mubr.f32.mxu1 %v1749_v30 }
 0x1d5   : > { %v3569_v34 = vpop.f32.mrf.mxu0  ;;  %3693 = vmatmul.mubr.f32.gmra.mxu1 %v1750_v32 }
 0x1d6   : > { %v1558_v15 = vadd.f32 %v3569_v34, %v4651_v2 }
 0x1d7   : > { %v1552_v36 = vpop.f32.mrf.mxu0 }
 0x1d8   : > { %v1553_v37 = vadd.f32 %v4651_v2, %v1552_v36  ;;  %v1752_v41 = vmax.f32 %v1558_v15, 0.0 }
 0x1da   : > { %v1751_v39 = vmax.f32 %v1553_v37, 0.0 }
 0x1dc   : > { %3695 = vmatprep.mubr.f32.mxu1 %v1751_v39 }
 0x1dd   : > { %v3572_v43 = vpop.f32.mrf.mxu1  ;;  %3696 = vmatmul.mubr.f32.gmra.mxu1 %v1752_v41 }
 0x1de   : > { %v1568_v45 = vadd.f32 %v3572_v43, %v4651_v2 }
 0x1df   : > { %v1562_v46 = vpop.f32.mrf.mxu1 }
 0x1e0   : > { %v1563_v47 = vadd.f32 %v4651_v2, %v1562_v46  ;;  %v1754_v49 = vmax.f32 %v1568_v45, 0.0 }
 0x1e2   : > { %v1753_v48 = vmax.f32 %v1563_v47, 0.0 }
 0x1e4   : > { %3698 = vmatprep.mubr.f32.mxu1 %v1753_v48 }
 0x1e5   : > { %v3575_v50 = vpop.f32.mrf.mxu1  ;;  %3699 = vmatmul.mubr.f32.gmra.mxu1 %v1754_v49 }
 0x1e6   : > { %v1578_v51 = vadd.f32 %v3575_v50, %v4651_v2 }
 0x1e7   : > { %v1572_v54 = vpop.f32.mrf.mxu1 }
 0x1e8   : > { %v1573_v55 = vadd.f32 %v4651_v2, %v1572_v54  ;;  %v1756_v58 = vmax.f32 %v1578_v51, 0.0 }
 0x1ea   : > { %v1755_v56 = vmax.f32 %v1573_v55, 0.0 }
 0x1ec   : > { %3701 = vmatprep.mubr.f32.mxu1 %v1755_v56 }
 0x1ed   : > { %v3578_v59 = vpop.f32.mrf.mxu1  ;;  %3702 = vmatmul.mubr.f32.gmra.mxu1 %v1756_v58 }
 0x1ee   : > { %v1588_v52 = vadd.f32 %v3578_v59, %v4651_v2 }
 0x1ef   : > { %v1582_v60 = vpop.f32.mrf.mxu1 }
 0x1f0   : > { %v1583_v61 = vadd.f32 %v4651_v2, %v1582_v60  ;;  %v1758_v0 = vmax.f32 %v1588_v52, 0.0 }
 0x1f2   : > { %v1757_v53 = vmax.f32 %v1583_v61, 0.0 }
 0x1f4   : > { %3704 = vmatprep.mubr.f32.mxu1 %v1757_v53 }
 0x1f5   : > { %v3581_v1 = vpop.f32.mrf.mxu1  ;;  %3705 = vmatmul.mubr.f32.gmra.mxu1 %v1758_v0 }
 0x1f6   : > { %v1598_v3 = vadd.f32 %v3581_v1, %v4651_v2 }
 0x1f7   : > { %v1592_v4 = vpop.f32.mrf.mxu1 }
 0x1f8   : > { %v1593_v6 = vadd.f32 %v4651_v2, %v1592_v4  ;;  %v1760_v8 = vmax.f32 %v1598_v3, 0.0 }
 0x1fa   : > { %v1759_v7 = vmax.f32 %v1593_v6, 0.0 }
 0x1fc   : > { %3707 = vmatprep.mubr.f32.mxu1 %v1759_v7 }
 0x1fd   : > { %v3584_v63 = vpop.f32.mrf.mxu1  ;;  %3708 = vmatmul.mubr.f32.gmra.mxu1 %v1760_v8 }
 0x1fe   : > { %v1608_v57 = vadd.f32 %v3584_v63, %v4651_v2 }
 0x1ff   : > { %v1602_v10 = vpop.f32.mrf.mxu1 }
 0x200   : > { %v1603_v11 = vadd.f32 %v4651_v2, %v1602_v10  ;;  %v1762_v13 = vmax.f32 %v1608_v57, 0.0 }
 0x202   : > { %v1761_v12 = vmax.f32 %v1603_v11, 0.0 }
 0x204   : > { %3710 = vmatprep.mubr.f32.mxu1 %v1761_v12 }
 0x205   : > { %v3587_v14 = vpop.f32.mrf.mxu1  ;;  %3711 = vmatmul.mubr.f32.gmra.mxu1 %v1762_v13 }
 0x206   : > { %v1618_v16 = vadd.f32 %v3587_v14, %v4651_v2 }
 0x207   : > { %v1612_v17 = vpop.f32.mrf.mxu1 }
 0x208   : > { %v1613_v62 = vadd.f32 %v4651_v2, %v1612_v17  ;;  %v1764_v9 = vmax.f32 %v1618_v16, 0.0  ;;  %v4771_v16 = vld [vmem:[%s4985_s6] ss:$0 sm:$0xff] }
 0x20a   : > { %v1763_v18 = vmax.f32 %v1613_v62, 0.0 }
 0x20c   : > { %3713 = vmatprep.mubr.f32.mxu1 %v1763_v18 }
 0x20d   : > { %v3590_v5 = vpop.f32.mrf.mxu1  ;;  %3714 = vmatmul.mubr.f32.gmra.mxu1 %v1764_v9 }
 0x20e   : > { %v1628_v19 = vadd.f32 %v3590_v5, %v4651_v2 }
 0x20f   : > { %v1622_v21 = vpop.f32.mrf.mxu1 }
 0x210   : > { %v1623_v22 = vadd.f32 %v4651_v2, %v1622_v21  ;;  %v1766_v24 = vmax.f32 %v1628_v19, 0.0 }
 0x212   : > { %v1765_v23 = vmax.f32 %v1623_v22, 0.0 }
 0x214   : > { %3716 = vmatprep.mubr.f32.mxu1 %v1765_v23 }
 0x215   : > { %v3593_v25 = vpop.f32.mrf.mxu1  ;;  %3717 = vmatmul.mubr.f32.gmra.mxu1 %v1766_v24 }
 0x216   : > { %v1638_v20 = vadd.f32 %v3593_v25, %v4651_v2 }
 0x217   : > { %v1632_v26 = vpop.f32.mrf.mxu1 }
 0x218   : > { %v1633_v27 = vadd.f32 %v4651_v2, %v1632_v26  ;;  %v1768_v29 = vmax.f32 %v1638_v20, 0.0 }
 0x21a   : > { %v1767_v28 = vmax.f32 %v1633_v27, 0.0 }
 0x21c   : > { %3719 = vmatprep.mubr.f32.mxu1 %v1767_v28 }
 0x21d   : > { %v3596_v30 = vpop.f32.mrf.mxu1  ;;  %3720 = vmatmul.mubr.f32.gmra.mxu1 %v1768_v29 }
 0x21e   : > { %v1648_v31 = vadd.f32 %v3596_v30, %v4651_v2 }
 0x21f   : > { %v1642_v32 = vpop.f32.mrf.mxu1 }
 0x220   : > { %v1643_v33 = vadd.f32 %v4651_v2, %v1642_v32  ;;  %v1770_v35 = vmax.f32 %v1648_v31, 0.0 }
 0x222   : > { %v1769_v34 = vmax.f32 %v1643_v33, 0.0 }
 0x224   : > { %3722 = vmatprep.mubr.f32.mxu1 %v1769_v34 }
 0x225   : > { %v3599_v15 = vpop.f32.mrf.mxu1  ;;  %3723 = vmatmul.mubr.f32.gmra.mxu1 %v1770_v35 }
 0x226   : > { %v1658_v36 = vadd.f32 %v3599_v15, %v4651_v2 }
 0x227   : > { %v1652_v37 = vpop.f32.mrf.mxu1 }
 0x228   : > { %v1653_v38 = vadd.f32 %v4651_v2, %v1652_v37  ;;  %v1772_v40 = vmax.f32 %v1658_v36, 0.0 }
 0x22a   : > { %v1771_v39 = vmax.f32 %v1653_v38, 0.0 }
 0x22c   : > { %3725 = vmatprep.mubr.f32.mxu1 %v1771_v39 }
 0x22d   : > { %v3602_v41 = vpop.f32.mrf.mxu1  ;;  %3726 = vmatmul.mubr.f32.gmra.mxu1 %v1772_v40 }
 0x22e   : > { %v1668_v42 = vadd.f32 %v3602_v41, %v4651_v2 }
 0x22f   : > { %v1662_v43 = vpop.f32.mrf.mxu1 }
 0x230   : > { %v1663_v44 = vadd.f32 %v4651_v2, %v1662_v43  ;;  %v1774_v46 = vmax.f32 %v1668_v42, 0.0 }
 0x232   : > { %v1773_v45 = vmax.f32 %v1663_v44, 0.0 }
 0x234   : > { %3728 = vmatprep.mubr.f32.mxu1 %v1773_v45 }
 0x235   : > { %v3605_v47 = vpop.f32.mrf.mxu1  ;;  %3729 = vmatmul.mubr.f32.gmra.mxu1 %v1774_v46 }
 0x236   : > { %v1678_v48 = vadd.f32 %v3605_v47, %v4651_v2 }
 0x237   : > { %v1672_v49 = vpop.f32.mrf.mxu1 }
 0x238   : > { %v1673_v50 = vadd.f32 %v4651_v2, %v1672_v49  ;;  %v1776_v54 = vmax.f32 %v1678_v48, 0.0 }
 0x23a   : > { %v1775_v51 = vmax.f32 %v1673_v50, 0.0 }
 0x23c   : > { %3731 = vmatprep.mubr.f32.mxu1 %v1775_v51 }
 0x23d   : > { %v3608_v55 = vpop.f32.mrf.mxu1  ;;  %3732 = vmatmul.mubr.f32.gmra.mxu1 %v1776_v54 }
 0x23e   : > { %v1688_v56 = vadd.f32 %v3608_v55, %v4651_v2 }
 0x23f   : > { %v1682_v58 = vpop.f32.mrf.mxu1 }
 0x240   : > { %v1683_v59 = vadd.f32 %v4651_v2, %v1682_v58  ;;  %v1778_v60 = vmax.f32 %v1688_v56, 0.0 }
 0x242   : > { %v1777_v52 = vmax.f32 %v1683_v59, 0.0 }
 0x244   : > { %3734 = vmatprep.mubr.f32.mxu1 %v1777_v52 }
 0x245   : > { %v3611_v61 = vpop.f32.mrf.mxu1  ;;  %3735 = vmatmul.mubr.f32.gmra.mxu1 %v1778_v60 }
 0x246   : > { %v1698_v53 = vadd.f32 %v3611_v61, %v4651_v2 }
 0x247   : > { %v1692_v0 = vpop.f32.mrf.mxu1 }
 0x248   : > { %v1693_v1 = vadd.f32 %v4651_v2, %v1692_v0  ;;  %v1780_v4 = vmax.f32 %v1698_v53, 0.0 }
 0x24a   : > { %v1779_v3 = vmax.f32 %v1693_v1, 0.0 }
 0x24c   : > { %3737 = vmatprep.mubr.f32.mxu1 %v1779_v3 }
 0x24d   : > { %v3614_v6 = vpop.f32.mrf.mxu1  ;;  %3738 = vmatmul.mubr.f32.gmra.mxu1 %v1780_v4 }
 0x24e   : > { %v1708_v7 = vadd.f32 %v3614_v6, %v4651_v2 }
 0x24f   : > { %v1702_v8 = vpop.f32.mrf.mxu1 }
 0x250   : > { %v1703_v63 = vadd.f32 %v4651_v2, %v1702_v8  ;;  %v1782_v10 = vmax.f32 %v1708_v7, 0.0 }
 0x252   : > { %v1781_v57 = vmax.f32 %v1703_v63, 0.0 }
 0x254   : > { %3740 = vmatprep.mubr.f32.mxu1 %v1781_v57 }
 0x255   : > { %v3617_v11 = vpop.f32.mrf.mxu1  ;;  %3741 = vmatmul.mubr.f32.gmra.mxu1 %v1782_v10 }
 0x256   : > { %v1718_v12 = vadd.f32 %v3617_v11, %v4651_v2 }
 0x257   : > { %v1712_v13 = vpop.f32.mrf.mxu1 }
 0x258   : > { %v1713_v14 = vadd.f32 %v4651_v2, %v1712_v13  ;;  %v1784_v18 = vmax.f32 %v1718_v12, 0.0 }
 0x259   : > { %v3652_v17 = vpop.f32.mrf.mxu1 }
 0x25a   : > { %v1783_v62 = vmax.f32 %v1713_v14, 0.0  ;;  %v1880_v9 = vadd.f32 %v3652_v17, %v4771_v16 }
 0x25b   : > { %v1874_v5 = vpop.f32.mrf.mxu1 }
 0x25c   : > { %v1875_v19 = vadd.f32 %v4771_v16, %v1874_v5  ;;  %3743 = vmatprep.mubr.f32.mxu1 %v1783_v62  ;;  %v2194_v23 = vmax.f32 %v1880_v9, 0.0 }
 0x25d   : > { %v3655_v21 = vpop.f32.mrf.mxu1  ;;  %3744 = vmatmul.mubr.f32.gmra.mxu1 %v1784_v18 }
 0x25e   : > { %v2193_v22 = vmax.f32 %v1875_v19, 0.0  ;;  %v1890_v2 = vadd.f32 %v3655_v21, %v4771_v16 }
 0x25f   : > { %v1884_v24 = vpop.f32.mrf.mxu1 }
 0x260   : > { %v1885_v25 = vadd.f32 %v4771_v16, %v1884_v24  ;;  %3778 = vmatprep.mubr.f32.mxu0 %v2193_v22  ;;  %v2196_v27 = vmax.f32 %v1890_v2, 0.0 }
 0x261   : > { %v3658_v20 = vpop.f32.mrf.mxu1  ;;  %3779 = vmatmul.mubr.f32.vlgmr.msra.gmra.mxu0 %v2194_v23 }
 0x262   : > { %v2195_v26 = vmax.f32 %v1885_v25, 0.0  ;;  %v1900_v28 = vadd.f32 %v3658_v20, %v4771_v16 }
 0x263   : > { %v1894_v29 = vpop.f32.mrf.mxu1 }
 0x264   : > { %v1895_v30 = vadd.f32 %v4771_v16, %v1894_v29  ;;  %3781 = vmatprep.mubr.f32.mxu0 %v2195_v26  ;;  %v2198_v33 = vmax.f32 %v1900_v28, 0.0 }
 0x265   : > { %v3661_v31 = vpop.f32.mrf.mxu1  ;;  %3782 = vmatmul.mubr.f32.gmra.mxu0 %v2196_v27 }
 0x266   : > { %v2197_v32 = vmax.f32 %v1895_v30, 0.0  ;;  %v1910_v34 = vadd.f32 %v3661_v31, %v4771_v16 }
 0x267   : > { %v1904_v35 = vpop.f32.mrf.mxu1 }
 0x268   : > { %v1905_v15 = vadd.f32 %v4771_v16, %v1904_v35  ;;  %3784 = vmatprep.mubr.f32.mxu0 %v2197_v32  ;;  %v2200_v38 = vmax.f32 %v1910_v34, 0.0 }
 0x269   : > { %v3664_v36 = vpop.f32.mrf.mxu1  ;;  %3785 = vmatmul.mubr.f32.gmra.mxu0 %v2198_v33 }
 0x26a   : > { %v2199_v37 = vmax.f32 %v1905_v15, 0.0  ;;  %v1920_v39 = vadd.f32 %v3664_v36, %v4771_v16 }
 0x26b   : > { %v1914_v40 = vpop.f32.mrf.mxu1 }
 0x26c   : > { %v1915_v41 = vadd.f32 %v4771_v16, %v1914_v40  ;;  %3787 = vmatprep.mubr.f32.mxu0 %v2199_v37  ;;  %v2202_v44 = vmax.f32 %v1920_v39, 0.0 }
 0x26d   : > { %v3667_v42 = vpop.f32.mrf.mxu1  ;;  %3788 = vmatmul.mubr.f32.gmra.mxu0 %v2200_v38 }
 0x26e   : > { %v2201_v43 = vmax.f32 %v1915_v41, 0.0  ;;  %v1930_v45 = vadd.f32 %v3667_v42, %v4771_v16 }
 0x26f   : > { %v1924_v46 = vpop.f32.mrf.mxu1 }
 0x270   : > { %v1925_v47 = vadd.f32 %v4771_v16, %v1924_v46  ;;  %3790 = vmatprep.mubr.f32.mxu0 %v2201_v43  ;;  %v2204_v50 = vmax.f32 %v1930_v45, 0.0 }
 0x271   : > { %v3670_v48 = vpop.f32.mrf.mxu1  ;;  %3791 = vmatmul.mubr.f32.gmra.mxu0 %v2202_v44 }
 0x272   : > { %v2203_v49 = vmax.f32 %v1925_v47, 0.0  ;;  %v1940_v51 = vadd.f32 %v3670_v48, %v4771_v16 }
 0x273   : > { %v1934_v54 = vpop.f32.mrf.mxu1 }
 0x274   : > { %v1935_v55 = vadd.f32 %v4771_v16, %v1934_v54  ;;  %3793 = vmatprep.mubr.f32.mxu0 %v2203_v49  ;;  %v2206_v59 = vmax.f32 %v1940_v51, 0.0 }
 0x275   : > { %v3673_v56 = vpop.f32.mrf.mxu1  ;;  %3794 = vmatmul.mubr.f32.gmra.mxu0 %v2204_v50 }
 0x276   : > { %v2205_v58 = vmax.f32 %v1935_v55, 0.0  ;;  %v1950_v52 = vadd.f32 %v3673_v56, %v4771_v16 }
 0x277   : > { %v1944_v60 = vpop.f32.mrf.mxu1 }
 0x278   : > { %v1945_v61 = vadd.f32 %v4771_v16, %v1944_v60  ;;  %3796 = vmatprep.mubr.f32.mxu0 %v2205_v58  ;;  %v2208_v1 = vmax.f32 %v1950_v52, 0.0 }
 0x279   : > { %v3676_v53 = vpop.f32.mrf.mxu1  ;;  %3797 = vmatmul.mubr.f32.gmra.mxu0 %v2206_v59 }
 0x27a   : > { %v2207_v0 = vmax.f32 %v1945_v61, 0.0  ;;  %v1960_v3 = vadd.f32 %v3676_v53, %v4771_v16 }
 0x27b   : > { %v1954_v4 = vpop.f32.mrf.mxu1 }
 0x27c   : > { %v1955_v6 = vadd.f32 %v4771_v16, %v1954_v4  ;;  %3799 = vmatprep.mubr.f32.mxu0 %v2207_v0  ;;  %v2210_v63 = vmax.f32 %v1960_v3, 0.0 }
 0x27d   : > { %v3679_v7 = vpop.f32.mrf.mxu1  ;;  %3800 = vmatmul.mubr.f32.gmra.mxu0 %v2208_v1 }
 0x27e   : > { %v2209_v8 = vmax.f32 %v1955_v6, 0.0  ;;  %v1970_v57 = vadd.f32 %v3679_v7, %v4771_v16 }
 0x27f   : > { %v1964_v10 = vpop.f32.mrf.mxu1 }
 0x280   : > { %v1965_v11 = vadd.f32 %v4771_v16, %v1964_v10  ;;  %3802 = vmatprep.mubr.f32.mxu0 %v2209_v8  ;;  %v2212_v14 = vmax.f32 %v1970_v57, 0.0 }
 0x281   : > { %v3682_v12 = vpop.f32.mrf.mxu1  ;;  %3803 = vmatmul.mubr.f32.gmra.mxu0 %v2210_v63 }
 0x282   : > { %v2211_v13 = vmax.f32 %v1965_v11, 0.0  ;;  %v1980_v17 = vadd.f32 %v3682_v12, %v4771_v16 }
 0x283   : > { %v1974_v62 = vpop.f32.mrf.mxu1 }
 0x284   : > { %v1975_v18 = vadd.f32 %v4771_v16, %v1974_v62  ;;  %3805 = vmatprep.mubr.f32.mxu0 %v2211_v13  ;;  %v2214_v19 = vmax.f32 %v1980_v17, 0.0 }
 0x285   : > { %v3685_v9 = vpop.f32.mrf.mxu1  ;;  %3806 = vmatmul.mubr.f32.gmra.mxu0 %v2212_v14 }
 0x286   : > { %v2213_v5 = vmax.f32 %v1975_v18, 0.0  ;;  %v1990_v21 = vadd.f32 %v3685_v9, %v4771_v16 }
 0x287   : > { %v1984_v22 = vpop.f32.mrf.mxu1 }
 0x288   : > { %v1985_v23 = vadd.f32 %v4771_v16, %v1984_v22  ;;  %3808 = vmatprep.mubr.f32.mxu0 %v2213_v5  ;;  %v2216_v25 = vmax.f32 %v1990_v21, 0.0 }
 0x289   : > { %v3688_v2 = vpop.f32.mrf.mxu1  ;;  %3809 = vmatmul.mubr.f32.gmra.mxu0 %v2214_v19 }
 0x28a   : > { %v2215_v24 = vmax.f32 %v1985_v23, 0.0  ;;  %v2000_v20 = vadd.f32 %v3688_v2, %v4771_v16 }
 0x28b   : > { %v1994_v26 = vpop.f32.mrf.mxu1 }
 0x28c   : > { %v1995_v27 = vadd.f32 %v4771_v16, %v1994_v26  ;;  %3811 = vmatprep.mubr.f32.mxu0 %v2215_v24  ;;  %v2218_v30 = vmax.f32 %v2000_v20, 0.0 }
 0x28d   : > { %v3691_v28 = vpop.f32.mrf.mxu1  ;;  %3812 = vmatmul.mubr.f32.gmra.mxu0 %v2216_v25 }
 0x28e   : > { %v2217_v29 = vmax.f32 %v1995_v27, 0.0  ;;  %v2010_v31 = vadd.f32 %v3691_v28, %v4771_v16 }
 0x28f   : > { %v2004_v32 = vpop.f32.mrf.mxu1 }
 0x290   : > { %v2005_v33 = vadd.f32 %v4771_v16, %v2004_v32  ;;  %3814 = vmatprep.mubr.f32.mxu0 %v2217_v29  ;;  %v2220_v35 = vmax.f32 %v2010_v31, 0.0 }
 0x291   : > { %3815 = vmatmul.mubr.f32.gmra.mxu0 %v2218_v30 }
 0x292   : > { %v2219_v34 = vmax.f32 %v2005_v33, 0.0 }
 0x294   : > { %3817 = vmatprep.mubr.f32.mxu0 %v2219_v34 }
 0x295   : > { %v3694_v15 = vpop.f32.mrf.mxu1  ;;  %3818 = vmatmul.mubr.f32.gmra.mxu0 %v2220_v35 }
 0x296   : > { %v2020_v36 = vadd.f32 %v3694_v15, %v4771_v16 }
 0x297   : > { %v2014_v37 = vpop.f32.mrf.mxu1 }
 0x298   : > { %v2015_v38 = vadd.f32 %v4771_v16, %v2014_v37  ;;  %v2222_v40 = vmax.f32 %v2020_v36, 0.0 }
 0x29a   : > { %v2221_v39 = vmax.f32 %v2015_v38, 0.0 }
 0x29c   : > { %3820 = vmatprep.mubr.f32.mxu0 %v2221_v39 }
 0x29d   : > { %v3697_v41 = vpop.f32.mrf.mxu1  ;;  %3821 = vmatmul.mubr.f32.gmra.mxu0 %v2222_v40 }
 0x29e   : > { %v2030_v42 = vadd.f32 %v3697_v41, %v4771_v16 }
 0x29f   : > { %v2024_v43 = vpop.f32.mrf.mxu1 }
 0x2a0   : > { %v2025_v44 = vadd.f32 %v4771_v16, %v2024_v43  ;;  %v2224_v46 = vmax.f32 %v2030_v42, 0.0 }
 0x2a2   : > { %v2223_v45 = vmax.f32 %v2025_v44, 0.0 }
 0x2a4   : > { %3823 = vmatprep.mubr.f32.mxu0 %v2223_v45 }
 0x2a5   : > { %v3700_v47 = vpop.f32.mrf.mxu1  ;;  %3824 = vmatmul.mubr.f32.gmra.mxu0 %v2224_v46 }
 0x2a6   : > { %v2040_v48 = vadd.f32 %v3700_v47, %v4771_v16 }
 0x2a7   : > { %v2034_v49 = vpop.f32.mrf.mxu1 }
 0x2a8   : > { %v2035_v50 = vadd.f32 %v4771_v16, %v2034_v49  ;;  %v2226_v54 = vmax.f32 %v2040_v48, 0.0 }
 0x2aa   : > { %v2225_v51 = vmax.f32 %v2035_v50, 0.0 }
 0x2ac   : > { %3826 = vmatprep.mubr.f32.mxu0 %v2225_v51 }
 0x2ad   : > { %v3703_v55 = vpop.f32.mrf.mxu1  ;;  %3827 = vmatmul.mubr.f32.gmra.mxu0 %v2226_v54 }
 0x2ae   : > { %v2050_v56 = vadd.f32 %v3703_v55, %v4771_v16 }
 0x2af   : > { %v2044_v58 = vpop.f32.mrf.mxu1 }
 0x2b0   : > { %v2045_v59 = vadd.f32 %v4771_v16, %v2044_v58  ;;  %v2228_v60 = vmax.f32 %v2050_v56, 0.0 }
 0x2b2   : > { %v2227_v52 = vmax.f32 %v2045_v59, 0.0 }
 0x2b4   : > { %3829 = vmatprep.mubr.f32.mxu0 %v2227_v52 }
 0x2b5   : > { %v3706_v61 = vpop.f32.mrf.mxu1  ;;  %3830 = vmatmul.mubr.f32.gmra.mxu0 %v2228_v60 }
 0x2b6   : > { %v2060_v53 = vadd.f32 %v3706_v61, %v4771_v16 }
 0x2b7   : > { %v2054_v0 = vpop.f32.mrf.mxu1 }
 0x2b8   : > { %v2055_v1 = vadd.f32 %v4771_v16, %v2054_v0  ;;  %v2230_v4 = vmax.f32 %v2060_v53, 0.0 }
 0x2ba   : > { %v2229_v3 = vmax.f32 %v2055_v1, 0.0 }
 0x2bc   : > { %3832 = vmatprep.mubr.f32.mxu0 %v2229_v3 }
 0x2bd   : > { %v3709_v6 = vpop.f32.mrf.mxu1  ;;  %3833 = vmatmul.mubr.f32.gmra.mxu0 %v2230_v4 }
 0x2be   : > { %v2070_v7 = vadd.f32 %v3709_v6, %v4771_v16 }
 0x2bf   : > { %v2064_v8 = vpop.f32.mrf.mxu1 }
 0x2c0   : > { %v2065_v63 = vadd.f32 %v4771_v16, %v2064_v8  ;;  %v2232_v10 = vmax.f32 %v2070_v7, 0.0 }
 0x2c2   : > { %v2231_v57 = vmax.f32 %v2065_v63, 0.0 }
 0x2c4   : > { %3835 = vmatprep.mubr.f32.mxu0 %v2231_v57 }
 0x2c5   : > { %v3712_v11 = vpop.f32.mrf.mxu1  ;;  %3836 = vmatmul.mubr.f32.gmra.mxu0 %v2232_v10 }
 0x2c6   : > { %v2080_v12 = vadd.f32 %v3712_v11, %v4771_v16 }
 0x2c7   : > { %v2074_v13 = vpop.f32.mrf.mxu1 }
 0x2c8   : > { %v2075_v14 = vadd.f32 %v4771_v16, %v2074_v13  ;;  %v2234_v62 = vmax.f32 %v2080_v12, 0.0 }
 0x2ca   : > { %v2233_v17 = vmax.f32 %v2075_v14, 0.0 }
 0x2cc   : > { %3838 = vmatprep.mubr.f32.mxu0 %v2233_v17 }
 0x2cd   : > { %v3715_v18 = vpop.f32.mrf.mxu1  ;;  %3839 = vmatmul.mubr.f32.gmra.mxu0 %v2234_v62 }
 0x2ce   : > { %v2090_v9 = vadd.f32 %v3715_v18, %v4771_v16  ;;  %v4839_v18 = vld [vmem:[%s4987_s8] ss:$0 sm:$0xff] }
 0x2cf   : > { %v2084_v5 = vpop.f32.mrf.mxu1 }
 0x2d0   : > { %v2085_v19 = vadd.f32 %v4771_v16, %v2084_v5  ;;  %v2236_v22 = vmax.f32 %v2090_v9, 0.0 }
 0x2d2   : > { %v2235_v21 = vmax.f32 %v2085_v19, 0.0 }
 0x2d4   : > { %3841 = vmatprep.mubr.f32.mxu0 %v2235_v21 }
 0x2d5   : > { %v3718_v23 = vpop.f32.mrf.mxu1  ;;  %3842 = vmatmul.mubr.f32.gmra.mxu0 %v2236_v22 }
 0x2d6   : > { %v2100_v2 = vadd.f32 %v3718_v23, %v4771_v16 }
 0x2d7   : > { %v2094_v24 = vpop.f32.mrf.mxu1 }
 0x2d8   : > { %v2095_v25 = vadd.f32 %v4771_v16, %v2094_v24  ;;  %v2238_v26 = vmax.f32 %v2100_v2, 0.0 }
 0x2da   : > { %v2237_v20 = vmax.f32 %v2095_v25, 0.0 }
 0x2dc   : > { %3844 = vmatprep.mubr.f32.mxu0 %v2237_v20 }
 0x2dd   : > { %v3721_v27 = vpop.f32.mrf.mxu1  ;;  %3845 = vmatmul.mubr.f32.gmra.mxu0 %v2238_v26 }
 0x2de   : > { %v2110_v28 = vadd.f32 %v3721_v27, %v4771_v16 }
 0x2df   : > { %v2104_v29 = vpop.f32.mrf.mxu1 }
 0x2e0   : > { %v2105_v30 = vadd.f32 %v4771_v16, %v2104_v29  ;;  %v2240_v32 = vmax.f32 %v2110_v28, 0.0 }
 0x2e2   : > { %v2239_v31 = vmax.f32 %v2105_v30, 0.0 }
 0x2e4   : > { %3847 = vmatprep.mubr.f32.mxu0 %v2239_v31 }
 0x2e5   : > { %v3724_v33 = vpop.f32.mrf.mxu1  ;;  %3848 = vmatmul.mubr.f32.gmra.mxu0 %v2240_v32 }
 0x2e6   : > { %v2120_v34 = vadd.f32 %v3724_v33, %v4771_v16 }
 0x2e7   : > { %v2114_v35 = vpop.f32.mrf.mxu1 }
 0x2e8   : > { %v2115_v15 = vadd.f32 %v4771_v16, %v2114_v35  ;;  %v2242_v37 = vmax.f32 %v2120_v34, 0.0 }
 0x2ea   : > { %v2241_v36 = vmax.f32 %v2115_v15, 0.0 }
 0x2ec   : > { %3850 = vmatprep.mubr.f32.mxu0 %v2241_v36 }
 0x2ed   : > { %v3727_v38 = vpop.f32.mrf.mxu1  ;;  %3851 = vmatmul.mubr.f32.gmra.mxu0 %v2242_v37 }
 0x2ee   : > { %v2130_v39 = vadd.f32 %v3727_v38, %v4771_v16 }
 0x2ef   : > { %v2124_v40 = vpop.f32.mrf.mxu1 }
 0x2f0   : > { %v2125_v41 = vadd.f32 %v4771_v16, %v2124_v40  ;;  %v2244_v43 = vmax.f32 %v2130_v39, 0.0 }
 0x2f2   : > { %v2243_v42 = vmax.f32 %v2125_v41, 0.0 }
 0x2f4   : > { %3853 = vmatprep.mubr.f32.mxu0 %v2243_v42 }
 0x2f5   : > { %v3730_v44 = vpop.f32.mrf.mxu1  ;;  %3854 = vmatmul.mubr.f32.gmra.mxu0 %v2244_v43 }
 0x2f6   : > { %v2140_v45 = vadd.f32 %v3730_v44, %v4771_v16 }
 0x2f7   : > { %v2134_v46 = vpop.f32.mrf.mxu1 }
 0x2f8   : > { %v2135_v47 = vadd.f32 %v4771_v16, %v2134_v46  ;;  %v2246_v49 = vmax.f32 %v2140_v45, 0.0 }
 0x2fa   : > { %v2245_v48 = vmax.f32 %v2135_v47, 0.0 }
 0x2fc   : > { %3856 = vmatprep.mubr.f32.mxu0 %v2245_v48 }
 0x2fd   : > { %v3733_v50 = vpop.f32.mrf.mxu1  ;;  %3857 = vmatmul.mubr.f32.gmra.mxu0 %v2246_v49 }
 0x2fe   : > { %v2150_v51 = vadd.f32 %v3733_v50, %v4771_v16 }
 0x2ff   : > { %v2144_v54 = vpop.f32.mrf.mxu1 }
 0x300   : > { %v2145_v55 = vadd.f32 %v4771_v16, %v2144_v54  ;;  %v2248_v58 = vmax.f32 %v2150_v51, 0.0 }
 0x302   : > { %v2247_v56 = vmax.f32 %v2145_v55, 0.0 }
 0x304   : > { %3859 = vmatprep.mubr.f32.mxu0 %v2247_v56 }
 0x305   : > { %v3736_v59 = vpop.f32.mrf.mxu1  ;;  %3860 = vmatmul.mubr.f32.gmra.mxu0 %v2248_v58 }
 0x306   : > { %v2160_v52 = vadd.f32 %v3736_v59, %v4771_v16 }
 0x307   : > { %v2154_v60 = vpop.f32.mrf.mxu1 }
 0x308   : > { %v2155_v61 = vadd.f32 %v4771_v16, %v2154_v60  ;;  %v2250_v0 = vmax.f32 %v2160_v52, 0.0 }
 0x30a   : > { %v2249_v53 = vmax.f32 %v2155_v61, 0.0 }
 0x30c   : > { %3862 = vmatprep.mubr.f32.mxu0 %v2249_v53 }
 0x30d   : > { %v3739_v1 = vpop.f32.mrf.mxu1  ;;  %3863 = vmatmul.mubr.f32.gmra.mxu0 %v2250_v0 }
 0x30e   : > { %v2170_v3 = vadd.f32 %v3739_v1, %v4771_v16 }
 0x30f   : > { %v2164_v4 = vpop.f32.mrf.mxu1 }
 0x310   : > { %v2165_v6 = vadd.f32 %v4771_v16, %v2164_v4  ;;  %v2252_v8 = vmax.f32 %v2170_v3, 0.0 }
 0x312   : > { %v2251_v7 = vmax.f32 %v2165_v6, 0.0 }
 0x314   : > { %3865 = vmatprep.mubr.f32.mxu0 %v2251_v7 }
 0x315   : > { %v3742_v63 = vpop.f32.mrf.mxu1  ;;  %3866 = vmatmul.mubr.f32.gmra.mxu0 %v2252_v8 }
 0x316   : > { %v2180_v57 = vadd.f32 %v3742_v63, %v4771_v16 }
 0x317   : > { %v2174_v10 = vpop.f32.mrf.mxu1 }
 0x318   : > { %v2175_v11 = vadd.f32 %v4771_v16, %v2174_v10  ;;  %v2254_v13 = vmax.f32 %v2180_v57, 0.0 }
 0x31a   : > { %v2253_v12 = vmax.f32 %v2175_v11, 0.0 }
 0x31c   : > { %3868 = vmatprep.mubr.f32.mxu0 %v2253_v12 }
 0x31d   : > { %v3745_v14 = vpop.f32.mrf.mxu1  ;;  %3869 = vmatmul.mubr.f32.gmra.mxu0 %v2254_v13 }
 0x31e   : > { %v2190_v17 = vadd.f32 %v3745_v14, %v4771_v16 }
 0x31f   : > { %v2184_v62 = vpop.f32.mrf.mxu1 }
 0x320   : > { %v2185_v9 = vadd.f32 %v4771_v16, %v2184_v62  ;;  %v2256_v22 = vmax.f32 %v2190_v17, 0.0 }
 0x321   : > { %v3780_v5 = vpop.f32.mrf.mxu0 }
 0x322   : > { %v2255_v19 = vmax.f32 %v2185_v9, 0.0  ;;  %v2352_v21 = vadd.f32 %v3780_v5, %v4839_v18 }
 0x323   : > { %v2346_v23 = vpop.f32.mrf.mxu0 }
 0x324   : > { %v3185_v2 = vmul.f32 -1.442695, %v2352_v21  ;;  %v2347_v24 = vadd.f32 %v4839_v18, %v2346_v23  ;;  %3871 = vmatprep.mubr.f32.mxu0 %v2255_v19 }
 0x325   : > { %v3783_v25 = vpop.f32.mrf.mxu0  ;;  %3872 = vmatmul.mubr.f32.gmra.mxu0 %v2256_v22 }
 0x326   : > { %3921 = vpow2.f32 %v3185_v2  ;;  %v3184_v20 = vmul.f32 -1.442695, %v2347_v24  ;;  %v2362_v26 = vadd.f32 %v3783_v25, %v4839_v18 }
 0x327   : > { %v2356_v27 = vpop.f32.mrf.mxu0 }
 0x328   : > { %3923 = vpow2.f32 %v3184_v20  ;;  %v3187_v28 = vmul.f32 -1.442695, %v2362_v26  ;;  %v2357_v16 = vadd.f32 %v4839_v18, %v2356_v27 }
 0x329   : > { %v3786_v29 = vpop.f32.mrf.mxu0 }
 0x32a   : > { %3925 = vpow2.f32 %v3187_v28  ;;  %v3186_v30 = vmul.f32 -1.442695, %v2357_v16  ;;  %v2372_v31 = vadd.f32 %v3786_v29, %v4839_v18 }
 0x32b   : > { %v2366_v32 = vpop.f32.mrf.mxu0 }
 0x32c   : > { %3927 = vpow2.f32 %v3186_v30  ;;  %v3189_v33 = vmul.f32 -1.442695, %v2372_v31  ;;  %v2367_v34 = vadd.f32 %v4839_v18, %v2366_v32 }
 0x32d   : > { %v3789_v35 = vpop.f32.mrf.mxu0 }
 0x32e   : > { %3929 = vpow2.f32 %v3189_v33  ;;  %v3188_v15 = vmul.f32 -1.442695, %v2367_v34  ;;  %v2382_v36 = vadd.f32 %v3789_v35, %v4839_v18 }
 0x32f   : > { %v2376_v37 = vpop.f32.mrf.mxu0 }
 0x330   : > { %3931 = vpow2.f32 %v3188_v15  ;;  %v3191_v38 = vmul.f32 -1.442695, %v2382_v36  ;;  %v2377_v39 = vadd.f32 %v4839_v18, %v2376_v37 }
 0x331   : > { %v3792_v40 = vpop.f32.mrf.mxu0 }
 0x332   : > { %3933 = vpow2.f32 %v3191_v38  ;;  %v3190_v41 = vmul.f32 -1.442695, %v2377_v39  ;;  %v2392_v42 = vadd.f32 %v3792_v40, %v4839_v18 }
 0x333   : > { %v3922_v43 = vpop.eup %3921  ;;  %v2386_v44 = vpop.f32.mrf.mxu0 }
 0x334   : > { %v2858_v45 = vadd.f32 1.0, %v3922_v43  ;;  %3935 = vpow2.f32 %v3190_v41  ;;  %v3193_v46 = vmul.f32 -1.442695, %v2392_v42  ;;  %v2387_v47 = vadd.f32 %v4839_v18, %v2386_v44 }
 0x335   : > { %v3924_v48 = vpop.eup %3923  ;;  %v3795_v49 = vpop.f32.mrf.mxu0 }
 0x336   : > { %3937 = vrcp.f32 %v2858_v45  ;;  %v2857_v50 = vadd.f32 1.0, %v3924_v48  ;;  %v3192_v51 = vmul.f32 -1.442695, %v2387_v47  ;;  %v2402_v54 = vadd.f32 %v3795_v49, %v4839_v18 }
 0x337   : > { %v3926_v55 = vpop.eup %3925  ;;  %3939 = vpow2.f32 %v3193_v46  ;;  %v2396_v56 = vpop.f32.mrf.mxu0 }
 0x338   : > { %3941 = vrcp.f32 %v2857_v50  ;;  %v2860_v58 = vadd.f32 1.0, %v3926_v55  ;;  %v3195_v59 = vmul.f32 -1.442695, %v2402_v54  ;;  %v2397_v52 = vadd.f32 %v4839_v18, %v2396_v56 }
 0x339   : > { %v3928_v60 = vpop.eup %3927  ;;  %3943 = vpow2.f32 %v3192_v51  ;;  %v3798_v61 = vpop.f32.mrf.mxu0 }
 0x33a   : > { %3945 = vrcp.f32 %v2860_v58  ;;  %v2859_v53 = vadd.f32 1.0, %v3928_v60  ;;  %v3194_v0 = vmul.f32 -1.442695, %v2397_v52  ;;  %v2412_v1 = vadd.f32 %v3798_v61, %v4839_v18 }
 0x33b   : > { %v3930_v3 = vpop.eup %3929  ;;  %3947 = vpow2.f32 %v3195_v59  ;;  %v2406_v4 = vpop.f32.mrf.mxu0 }
 0x33c   : > { %3949 = vrcp.f32 %v2859_v53  ;;  %v2862_v6 = vadd.f32 1.0, %v3930_v3  ;;  %v3197_v7 = vmul.f32 -1.442695, %v2412_v1  ;;  %v2407_v8 = vadd.f32 %v4839_v18, %v2406_v4 }
 0x33d   : > { %v3932_v63 = vpop.eup %3931  ;;  %3951 = vpow2.f32 %v3194_v0  ;;  %v3801_v57 = vpop.f32.mrf.mxu0 }
 0x33e   : > { %3953 = vrcp.f32 %v2862_v6  ;;  %v2861_v10 = vadd.f32 1.0, %v3932_v63  ;;  %v3196_v11 = vmul.f32 -1.442695, %v2407_v8  ;;  %v2422_v12 = vadd.f32 %v3801_v57, %v4839_v18 }
 0x33f   : > { %v3934_v13 = vpop.eup %3933  ;;  %3955 = vpow2.f32 %v3197_v7  ;;  %v2416_v14 = vpop.f32.mrf.mxu0 }
 0x340   : > { %3957 = vrcp.f32 %v2861_v10  ;;  %v2864_v17 = vadd.f32 1.0, %v3934_v13  ;;  %v3199_v62 = vmul.f32 -1.442695, %v2422_v12  ;;  %v2417_v9 = vadd.f32 %v4839_v18, %v2416_v14 }
 0x341   : > { %v3936_v5 = vpop.eup %3935  ;;  %3959 = vpow2.f32 %v3196_v11  ;;  %v3804_v19 = vpop.f32.mrf.mxu0 }
 0x342   : > { %3961 = vrcp.f32 %v2864_v17  ;;  %v2863_v21 = vadd.f32 1.0, %v3936_v5  ;;  %v3198_v22 = vmul.f32 -1.442695, %v2417_v9  ;;  %v2432_v23 = vadd.f32 %v3804_v19, %v4839_v18 }
 0x343   : > { %v3938_v2 = vpop.eup %3937  ;;  %3963 = vpow2.f32 %v3199_v62  ;;  %v2426_v24 = vpop.f32.mrf.mxu0 }
 0x344   : > { %v3940_v25 = vpop.eup %3939  ;;  %3050 = vst [vmem:[%s4863_s25 + $0x8] sm:$0xff] %v3938_v2  ;;  %3965 = vrcp.f32 %v2863_v21  ;;  %v3201_v20 = vmul.f32 -1.442695, %v2432_v23  ;;  %v2427_v26 = vadd.f32 %v4839_v18, %v2426_v24 }
 0x345   : > { %v3942_v27 = vpop.eup %3941  ;;  %v2866_v28 = vadd.f32 1.0, %v3940_v25  ;;  %3967 = vpow2.f32 %v3198_v22  ;;  %v3807_v16 = vpop.f32.mrf.mxu0 }
 0x346   : > { %v3944_v29 = vpop.eup %3943  ;;  %3049 = vst [vmem:[%s4863_s25] sm:$0xff] %v3942_v27  ;;  %3969 = vpow2.f32 %v3201_v20  ;;  %v3200_v30 = vmul.f32 -1.442695, %v2427_v26  ;;  %v2442_v31 = vadd.f32 %v3807_v16, %v4839_v18 }
 0x347   : > { %v3946_v32 = vpop.eup %3945  ;;  %3971 = vrcp.f32 %v2866_v28  ;;  %v2865_v33 = vadd.f32 1.0, %v3944_v29  ;;  %v2436_v34 = vpop.f32.mrf.mxu0 }
 0x348   : > { %v3948_v35 = vpop.eup %3947  ;;  %3052 = vst [vmem:[%s4863_s25 + $0x18] sm:$0xff] %v3946_v32  ;;  %3973 = vpow2.f32 %v3200_v30  ;;  %v3203_v15 = vmul.f32 -1.442695, %v2442_v31  ;;  %v2437_v36 = vadd.f32 %v4839_v18, %v2436_v34 }
 0x349   : > { %v3950_v37 = vpop.eup %3949  ;;  %3975 = vrcp.f32 %v2865_v33  ;;  %v2868_v38 = vadd.f32 1.0, %v3948_v35  ;;  %v3810_v39 = vpop.f32.mrf.mxu0 }
 0x34a   : > { %v3952_v40 = vpop.eup %3951  ;;  %3051 = vst [vmem:[%s4863_s25 + $0x10] sm:$0xff] %v3950_v37  ;;  %3977 = vpow2.f32 %v3203_v15  ;;  %v3202_v41 = vmul.f32 -1.442695, %v2437_v36  ;;  %v2452_v42 = vadd.f32 %v3810_v39, %v4839_v18 }
 0x34b   : > { %v3954_v43 = vpop.eup %3953  ;;  %3979 = vrcp.f32 %v2868_v38  ;;  %v2867_v44 = vadd.f32 1.0, %v3952_v40  ;;  %v2446_v45 = vpop.f32.mrf.mxu0 }
 0x34c   : > { %v3956_v46 = vpop.eup %3955  ;;  %3054 = vst [vmem:[%s4863_s25 + $0x28] sm:$0xff] %v3954_v43  ;;  %3981 = vpow2.f32 %v3202_v41  ;;  %v3205_v47 = vmul.f32 -1.442695, %v2452_v42  ;;  %v2447_v48 = vadd.f32 %v4839_v18, %v2446_v45 }
 0x34d   : > { %v3958_v49 = vpop.eup %3957  ;;  %3983 = vrcp.f32 %v2867_v44  ;;  %v2870_v50 = vadd.f32 1.0, %v3956_v46  ;;  %v3813_v51 = vpop.f32.mrf.mxu0 }
 0x34e   : > { %v3960_v54 = vpop.eup %3959  ;;  %3053 = vst [vmem:[%s4863_s25 + $0x20] sm:$0xff] %v3958_v49  ;;  %3985 = vpow2.f32 %v3205_v47  ;;  %v3204_v55 = vmul.f32 -1.442695, %v2447_v48  ;;  %v2462_v56 = vadd.f32 %v3813_v51, %v4839_v18 }
 0x34f   : > { %v3962_v58 = vpop.eup %3961  ;;  %3987 = vrcp.f32 %v2870_v50  ;;  %v2869_v59 = vadd.f32 1.0, %v3960_v54  ;;  %v2456_v52 = vpop.f32.mrf.mxu0 }
 0x350   : > { %v3964_v60 = vpop.eup %3963  ;;  %3056 = vst [vmem:[%s4863_s25 + $0x38] sm:$0xff] %v3962_v58  ;;  %3989 = vpow2.f32 %v3204_v55  ;;  %v3207_v61 = vmul.f32 -1.442695, %v2462_v56  ;;  %v2457_v53 = vadd.f32 %v4839_v18, %v2456_v52 }
 0x351   : > { %v3966_v0 = vpop.eup %3965  ;;  %3991 = vrcp.f32 %v2869_v59  ;;  %v2872_v1 = vadd.f32 1.0, %v3964_v60  ;;  %v3816_v3 = vpop.f32.mrf.mxu0 }
 0x352   : > { %v3968_v4 = vpop.eup %3967  ;;  %3055 = vst [vmem:[%s4863_s25 + $0x30] sm:$0xff] %v3966_v0  ;;  %3993 = vpow2.f32 %v3207_v61  ;;  %v3206_v6 = vmul.f32 -1.442695, %v2457_v53  ;;  %v2472_v7 = vadd.f32 %v3816_v3, %v4839_v18 }
 0x353   : > { %v3970_v8 = vpop.eup %3969  ;;  %3995 = vrcp.f32 %v2872_v1  ;;  %v2871_v63 = vadd.f32 1.0, %v3968_v4  ;;  %v2466_v57 = vpop.f32.mrf.mxu0 }
 0x354   : > { %v3972_v10 = vpop.eup %3971  ;;  %v2874_v11 = vadd.f32 1.0, %v3970_v8  ;;  %3997 = vpow2.f32 %v3206_v6  ;;  %v3209_v12 = vmul.f32 -1.442695, %v2472_v7  ;;  %v2467_v13 = vadd.f32 %v4839_v18, %v2466_v57 }
 0x355   : > { %v3974_v14 = vpop.eup %3973  ;;  %3058 = vst [vmem:[%s4863_s25 + $0x48] sm:$0xff] %v3972_v10  ;;  %3999 = vrcp.f32 %v2871_v63  ;;  %v3819_v17 = vpop.f32.mrf.mxu0 }
 0x356   : > { %v3976_v62 = vpop.eup %3975  ;;  %4001 = vrcp.f32 %v2874_v11  ;;  %v2873_v9 = vadd.f32 1.0, %v3974_v14  ;;  %v3208_v5 = vmul.f32 -1.442695, %v2467_v13  ;;  %v2482_v19 = vadd.f32 %v3819_v17, %v4839_v18 }
 0x357   : > { %v3978_v21 = vpop.eup %3977  ;;  %3057 = vst [vmem:[%s4863_s25 + $0x40] sm:$0xff] %v3976_v62  ;;  %4003 = vpow2.f32 %v3209_v12  ;;  %v2476_v22 = vpop.f32.mrf.mxu0 }
 0x358   : > { %v3980_v23 = vpop.eup %3979  ;;  %4005 = vrcp.f32 %v2873_v9  ;;  %v2876_v2 = vadd.f32 1.0, %v3978_v21  ;;  %v3211_v24 = vmul.f32 -1.442695, %v2482_v19  ;;  %v2477_v25 = vadd.f32 %v4839_v18, %v2476_v22 }
 0x359   : > { %v3982_v20 = vpop.eup %3981  ;;  %3060 = vst [vmem:[%s4863_s25 + $0x58] sm:$0xff] %v3980_v23  ;;  %4007 = vpow2.f32 %v3208_v5 }
 0x35a   : > { %v3984_v26 = vpop.eup %3983  ;;  %4009 = vrcp.f32 %v2876_v2  ;;  %v2875_v27 = vadd.f32 1.0, %v3982_v20  ;;  %v3210_v28 = vmul.f32 -1.442695, %v2477_v25 }
 0x35b   : > { %v3986_v16 = vpop.eup %3985  ;;  %3059 = vst [vmem:[%s4863_s25 + $0x50] sm:$0xff] %v3984_v26  ;;  %4011 = vpow2.f32 %v3211_v24 }
 0x35c   : > { %v3988_v29 = vpop.eup %3987  ;;  %4013 = vrcp.f32 %v2875_v27  ;;  %v2878_v30 = vadd.f32 1.0, %v3986_v16 }
 0x35d   : > { %v3990_v31 = vpop.eup %3989  ;;  %3062 = vst [vmem:[%s4863_s25 + $0x68] sm:$0xff] %v3988_v29  ;;  %4015 = vpow2.f32 %v3210_v28  ;;  %v3822_v32 = vpop.f32.mrf.mxu0 }
 0x35e   : > { %v3992_v33 = vpop.eup %3991  ;;  %4017 = vrcp.f32 %v2878_v30  ;;  %v2877_v34 = vadd.f32 1.0, %v3990_v31  ;;  %v2492_v35 = vadd.f32 %v3822_v32, %v4839_v18 }
 0x35f   : > { %v3994_v15 = vpop.eup %3993  ;;  %3061 = vst [vmem:[%s4863_s25 + $0x60] sm:$0xff] %v3992_v33  ;;  %v2486_v36 = vpop.f32.mrf.mxu0 }
 0x360   : > { %v3996_v37 = vpop.eup %3995  ;;  %4019 = vrcp.f32 %v2877_v34  ;;  %v2880_v38 = vadd.f32 1.0, %v3994_v15  ;;  %v3213_v39 = vmul.f32 -1.442695, %v2492_v35  ;;  %v2487_v40 = vadd.f32 %v4839_v18, %v2486_v36 }
 0x361   : > { %v3998_v41 = vpop.eup %3997  ;;  %3064 = vst [vmem:[%s4863_s25 + $0x78] sm:$0xff] %v3996_v37 }
 0x362   : > { %v4000_v42 = vpop.eup %3999  ;;  %4021 = vrcp.f32 %v2880_v38  ;;  %v2879_v43 = vadd.f32 1.0, %v3998_v41  ;;  %v3212_v44 = vmul.f32 -1.442695, %v2487_v40 }
 0x363   : > { %v4002_v45 = vpop.eup %4001  ;;  %3063 = vst [vmem:[%s4863_s25 + $0x70] sm:$0xff] %v4000_v42  ;;  %4023 = vpow2.f32 %v3213_v39 }
 0x364   : > { %v4004_v46 = vpop.eup %4003  ;;  %3066 = vst [vmem:[%s4863_s25 + $0x88] sm:$0xff] %v4002_v45  ;;  %4025 = vrcp.f32 %v2879_v43 }
 0x365   : > { %v4006_v47 = vpop.eup %4005  ;;  %v2882_v48 = vadd.f32 1.0, %v4004_v46  ;;  %4027 = vpow2.f32 %v3212_v44  ;;  %v3825_v49 = vpop.f32.mrf.mxu0 }
 0x366   : > { %v4008_v50 = vpop.eup %4007  ;;  %3065 = vst [vmem:[%s4863_s25 + $0x80] sm:$0xff] %v4006_v47  ;;  %v2502_v51 = vadd.f32 %v3825_v49, %v4839_v18 }
 0x367   : > { %v4010_v54 = vpop.eup %4009  ;;  %4029 = vrcp.f32 %v2882_v48  ;;  %v2881_v55 = vadd.f32 1.0, %v4008_v50  ;;  %v2496_v56 = vpop.f32.mrf.mxu0 }
 0x368   : > { %v4012_v58 = vpop.eup %4011  ;;  %3068 = vst [vmem:[%s4863_s25 + $0x98] sm:$0xff] %v4010_v54  ;;  %v3215_v59 = vmul.f32 -1.442695, %v2502_v51  ;;  %v2497_v52 = vadd.f32 %v4839_v18, %v2496_v56 }
 0x369   : > { %v4014_v60 = vpop.eup %4013  ;;  %4031 = vrcp.f32 %v2881_v55  ;;  %v2884_v61 = vadd.f32 1.0, %v4012_v58 }
 0x36a   : > { %v4016_v53 = vpop.eup %4015  ;;  %3067 = vst [vmem:[%s4863_s25 + $0x90] sm:$0xff] %v4014_v60  ;;  %4033 = vpow2.f32 %v3215_v59  ;;  %v3214_v0 = vmul.f32 -1.442695, %v2497_v52 }
 0x36b   : > { %v4018_v1 = vpop.eup %4017  ;;  %4035 = vrcp.f32 %v2884_v61  ;;  %v2883_v3 = vadd.f32 1.0, %v4016_v53 }
 0x36c   : > { %3070 = vst [vmem:[%s4863_s25 + $0xa8] sm:$0xff] %v4018_v1  ;;  %4037 = vpow2.f32 %v3214_v0 }
 0x36d   : > { %v4020_v4 = vpop.eup %4019  ;;  %4039 = vrcp.f32 %v2883_v3  ;;  %v3828_v6 = vpop.f32.mrf.mxu0 }
 0x36e   : > { %3069 = vst [vmem:[%s4863_s25 + $0xa0] sm:$0xff] %v4020_v4  ;;  %v2512_v7 = vadd.f32 %v3828_v6, %v4839_v18 }
 0x36f   : > { %v4022_v8 = vpop.eup %4021  ;;  %v2506_v63 = vpop.f32.mrf.mxu0 }
 0x370   : > { %v4024_v57 = vpop.eup %4023  ;;  %3072 = vst [vmem:[%s4863_s25 + $0xb8] sm:$0xff] %v4022_v8  ;;  %v3217_v10 = vmul.f32 -1.442695, %v2512_v7  ;;  %v2507_v11 = vadd.f32 %v4839_v18, %v2506_v63 }
 0x371   : > { %v4026_v12 = vpop.eup %4025  ;;  %v2886_v13 = vadd.f32 1.0, %v4024_v57 }
 0x372   : > { %v4028_v14 = vpop.eup %4027  ;;  %3071 = vst [vmem:[%s4863_s25 + $0xb0] sm:$0xff] %v4026_v12  ;;  %4041 = vpow2.f32 %v3217_v10  ;;  %v3216_v17 = vmul.f32 -1.442695, %v2507_v11 }
 0x373   : > { %4043 = vrcp.f32 %v2886_v13  ;;  %v2885_v62 = vadd.f32 1.0, %v4028_v14 }
 0x374   : > { %v4030_v9 = vpop.eup %4029  ;;  %4045 = vpow2.f32 %v3216_v17 }
 0x375   : > { %3074 = vst [vmem:[%s4863_s25 + $0xc8] sm:$0xff] %v4030_v9  ;;  %4047 = vrcp.f32 %v2885_v62  ;;  %v3831_v5 = vpop.f32.mrf.mxu0 }
 0x376   : > { %v4032_v19 = vpop.eup %4031  ;;  %v2522_v21 = vadd.f32 %v3831_v5, %v4839_v18 }
 0x377   : > { %v4034_v22 = vpop.eup %4033  ;;  %3073 = vst [vmem:[%s4863_s25 + $0xc0] sm:$0xff] %v4032_v19  ;;  %v2516_v23 = vpop.f32.mrf.mxu0 }
 0x378   : > { %v4036_v2 = vpop.eup %4035  ;;  %v2888_v24 = vadd.f32 1.0, %v4034_v22  ;;  %v3219_v25 = vmul.f32 -1.442695, %v2522_v21  ;;  %v2517_v20 = vadd.f32 %v4839_v18, %v2516_v23 }
 0x379   : > { %v4038_v26 = vpop.eup %4037  ;;  %3076 = vst [vmem:[%s4863_s25 + $0xd8] sm:$0xff] %v4036_v2 }
 0x37a   : > { %v4040_v27 = vpop.eup %4039  ;;  %4049 = vrcp.f32 %v2888_v24  ;;  %v2887_v28 = vadd.f32 1.0, %v4038_v26  ;;  %v3218_v16 = vmul.f32 -1.442695, %v2517_v20 }
 0x37b   : > { %3075 = vst [vmem:[%s4863_s25 + $0xd0] sm:$0xff] %v4040_v27  ;;  %4051 = vpow2.f32 %v3219_v25 }
 0x37c   : > { %4053 = vrcp.f32 %v2887_v28 }
 0x37d   : > { %4055 = vpow2.f32 %v3218_v16  ;;  %v3834_v29 = vpop.f32.mrf.mxu0 }
 0x37e   : > { %v2532_v30 = vadd.f32 %v3834_v29, %v4839_v18 }
 0x37f   : > { %v4042_v31 = vpop.eup %4041  ;;  %v2526_v32 = vpop.f32.mrf.mxu0 }
 0x380   : > { %v4044_v33 = vpop.eup %4043  ;;  %v2890_v34 = vadd.f32 1.0, %v4042_v31  ;;  %v3221_v35 = vmul.f32 -1.442695, %v2532_v30  ;;  %v2527_v15 = vadd.f32 %v4839_v18, %v2526_v32 }
 0x381   : > { %v4046_v36 = vpop.eup %4045  ;;  %3078 = vst [vmem:[%s4863_s25 + $0xe8] sm:$0xff] %v4044_v33 }
 0x382   : > { %v4048_v37 = vpop.eup %4047  ;;  %4057 = vrcp.f32 %v2890_v34  ;;  %v2889_v38 = vadd.f32 1.0, %v4046_v36  ;;  %v3220_v39 = vmul.f32 -1.442695, %v2527_v15 }
 0x383   : > { %3077 = vst [vmem:[%s4863_s25 + $0xe0] sm:$0xff] %v4048_v37  ;;  %4059 = vpow2.f32 %v3221_v35 }
 0x384   : > { %4061 = vrcp.f32 %v2889_v38 }
 0x385   : > { %4063 = vpow2.f32 %v3220_v39  ;;  %v3837_v40 = vpop.f32.mrf.mxu0 }
 0x386   : > { %v2542_v41 = vadd.f32 %v3837_v40, %v4839_v18 }
 0x387   : > { %v4050_v42 = vpop.eup %4049  ;;  %v2536_v43 = vpop.f32.mrf.mxu0 }
 0x388   : > { %v4052_v44 = vpop.eup %4051  ;;  %3080 = vst [vmem:[%s4863_s25 + $0xf8] sm:$0xff] %v4050_v42  ;;  %v3223_v45 = vmul.f32 -1.442695, %v2542_v41  ;;  %v2537_v46 = vadd.f32 %v4839_v18, %v2536_v43 }
 0x389   : > { %v4054_v47 = vpop.eup %4053  ;;  %v2892_v48 = vadd.f32 1.0, %v4052_v44 }
 0x38a   : > { %v4056_v49 = vpop.eup %4055  ;;  %3079 = vst [vmem:[%s4863_s25 + $0xf0] sm:$0xff] %v4054_v47  ;;  %4065 = vpow2.f32 %v3223_v45  ;;  %v3222_v50 = vmul.f32 -1.442695, %v2537_v46 }
 0x38b   : > { %4067 = vrcp.f32 %v2892_v48  ;;  %v2891_v51 = vadd.f32 1.0, %v4056_v49 }
 0x38c   : > { %4069 = vpow2.f32 %v3222_v50 }
 0x38d   : > { %4071 = vrcp.f32 %v2891_v51  ;;  %v3840_v54 = vpop.f32.mrf.mxu0 }
 0x38e   : > { %v2552_v55 = vadd.f32 %v3840_v54, %v4839_v18 }
 0x38f   : > { %v4058_v56 = vpop.eup %4057  ;;  %v2546_v58 = vpop.f32.mrf.mxu0 }
 0x390   : > { %v4060_v59 = vpop.eup %4059  ;;  %3082 = vst [vmem:[%s4863_s25 + $0x108] sm:$0xff] %v4058_v56  ;;  %v3225_v52 = vmul.f32 -1.442695, %v2552_v55  ;;  %v2547_v60 = vadd.f32 %v4839_v18, %v2546_v58 }
 0x391   : > { %v4062_v61 = vpop.eup %4061  ;;  %v2894_v53 = vadd.f32 1.0, %v4060_v59 }
 0x392   : > { %v4064_v0 = vpop.eup %4063  ;;  %3081 = vst [vmem:[%s4863_s25 + $0x100] sm:$0xff] %v4062_v61  ;;  %4073 = vpow2.f32 %v3225_v52  ;;  %v3224_v1 = vmul.f32 -1.442695, %v2547_v60 }
 0x393   : > { %4075 = vrcp.f32 %v2894_v53  ;;  %v2893_v3 = vadd.f32 1.0, %v4064_v0 }
 0x394   : > { %4077 = vpow2.f32 %v3224_v1 }
 0x395   : > { %4079 = vrcp.f32 %v2893_v3  ;;  %v3843_v4 = vpop.f32.mrf.mxu0 }
 0x396   : > { %v2562_v6 = vadd.f32 %v3843_v4, %v4839_v18 }
 0x397   : > { %v4066_v7 = vpop.eup %4065  ;;  %v2556_v8 = vpop.f32.mrf.mxu0 }
 0x398   : > { %v4068_v63 = vpop.eup %4067  ;;  %v2896_v57 = vadd.f32 1.0, %v4066_v7  ;;  %v3227_v10 = vmul.f32 -1.442695, %v2562_v6  ;;  %v2557_v11 = vadd.f32 %v4839_v18, %v2556_v8 }
 0x399   : > { %v4070_v12 = vpop.eup %4069  ;;  %3084 = vst [vmem:[%s4863_s25 + $0x118] sm:$0xff] %v4068_v63 }
 0x39a   : > { %v4072_v13 = vpop.eup %4071  ;;  %4081 = vrcp.f32 %v2896_v57  ;;  %v2895_v14 = vadd.f32 1.0, %v4070_v12  ;;  %v3226_v17 = vmul.f32 -1.442695, %v2557_v11 }
 0x39b   : > { %3083 = vst [vmem:[%s4863_s25 + $0x110] sm:$0xff] %v4072_v13  ;;  %4083 = vpow2.f32 %v3227_v10 }
 0x39c   : > { %4085 = vrcp.f32 %v2895_v14 }
 0x39d   : > { %4087 = vpow2.f32 %v3226_v17  ;;  %v3846_v62 = vpop.f32.mrf.mxu0 }
 0x39e   : > { %v2572_v9 = vadd.f32 %v3846_v62, %v4839_v18 }
 0x39f   : > { %v4074_v5 = vpop.eup %4073  ;;  %v2566_v19 = vpop.f32.mrf.mxu0 }
 0x3a0   : > { %v4076_v21 = vpop.eup %4075  ;;  %v2898_v22 = vadd.f32 1.0, %v4074_v5  ;;  %v3229_v23 = vmul.f32 -1.442695, %v2572_v9  ;;  %v2567_v2 = vadd.f32 %v4839_v18, %v2566_v19 }
 0x3a1   : > { %v4078_v24 = vpop.eup %4077  ;;  %3086 = vst [vmem:[%s4863_s25 + $0x128] sm:$0xff] %v4076_v21 }
 0x3a2   : > { %v4080_v25 = vpop.eup %4079  ;;  %4089 = vrcp.f32 %v2898_v22  ;;  %v2897_v20 = vadd.f32 1.0, %v4078_v24  ;;  %v3228_v26 = vmul.f32 -1.442695, %v2567_v2 }
 0x3a3   : > { %3085 = vst [vmem:[%s4863_s25 + $0x120] sm:$0xff] %v4080_v25  ;;  %4091 = vpow2.f32 %v3229_v23 }
 0x3a4   : > { %4093 = vrcp.f32 %v2897_v20 }
 0x3a5   : > { %4095 = vpow2.f32 %v3228_v26  ;;  %v3849_v27 = vpop.f32.mrf.mxu0 }
 0x3a6   : > { %v2582_v28 = vadd.f32 %v3849_v27, %v4839_v18 }
 0x3a7   : > { %v4082_v16 = vpop.eup %4081  ;;  %v2576_v29 = vpop.f32.mrf.mxu0 }
 0x3a8   : > { %v4084_v30 = vpop.eup %4083  ;;  %3088 = vst [vmem:[%s4863_s25 + $0x138] sm:$0xff] %v4082_v16  ;;  %v3231_v31 = vmul.f32 -1.442695, %v2582_v28  ;;  %v2577_v32 = vadd.f32 %v4839_v18, %v2576_v29 }
 0x3a9   : > { %v4086_v33 = vpop.eup %4085  ;;  %v2900_v34 = vadd.f32 1.0, %v4084_v30 }
 0x3aa   : > { %v4088_v35 = vpop.eup %4087  ;;  %3087 = vst [vmem:[%s4863_s25 + $0x130] sm:$0xff] %v4086_v33  ;;  %4097 = vpow2.f32 %v3231_v31  ;;  %v3230_v15 = vmul.f32 -1.442695, %v2577_v32 }
 0x3ab   : > { %4099 = vrcp.f32 %v2900_v34  ;;  %v2899_v36 = vadd.f32 1.0, %v4088_v35 }
 0x3ac   : > { %4101 = vpow2.f32 %v3230_v15 }
 0x3ad   : > { %4103 = vrcp.f32 %v2899_v36  ;;  %v3852_v37 = vpop.f32.mrf.mxu0 }
 0x3ae   : > { %v2592_v38 = vadd.f32 %v3852_v37, %v4839_v18 }
 0x3af   : > { %v4090_v39 = vpop.eup %4089  ;;  %v2586_v40 = vpop.f32.mrf.mxu0 }
 0x3b0   : > { %v4092_v41 = vpop.eup %4091  ;;  %3090 = vst [vmem:[%s4863_s25 + $0x148] sm:$0xff] %v4090_v39  ;;  %v3233_v42 = vmul.f32 -1.442695, %v2592_v38  ;;  %v2587_v43 = vadd.f32 %v4839_v18, %v2586_v40 }
 0x3b1   : > { %v4094_v44 = vpop.eup %4093  ;;  %v2902_v45 = vadd.f32 1.0, %v4092_v41 }
 0x3b2   : > { %v4096_v46 = vpop.eup %4095  ;;  %3089 = vst [vmem:[%s4863_s25 + $0x140] sm:$0xff] %v4094_v44  ;;  %4105 = vpow2.f32 %v3233_v42  ;;  %v3232_v47 = vmul.f32 -1.442695, %v2587_v43 }
 0x3b3   : > { %4107 = vrcp.f32 %v2902_v45  ;;  %v2901_v48 = vadd.f32 1.0, %v4096_v46 }
 0x3b4   : > { %4109 = vpow2.f32 %v3232_v47  ;;  %v4180_v47 = vld [vmem:[%s4987_s8] ss:$0 sm:$0xff] }
 0x3b5   : > { %4111 = vrcp.f32 %v2901_v48  ;;  %v3855_v49 = vpop.f32.mrf.mxu0 }
 0x3b6   : > { %v2602_v50 = vadd.f32 %v3855_v49, %v4839_v18 }
 0x3b7   : > { %v4098_v51 = vpop.eup %4097  ;;  %v2596_v54 = vpop.f32.mrf.mxu0 }
 0x3b8   : > { %v4100_v55 = vpop.eup %4099  ;;  %v2904_v56 = vadd.f32 1.0, %v4098_v51  ;;  %v3235_v58 = vmul.f32 -1.442695, %v2602_v50  ;;  %v2597_v59 = vadd.f32 %v4839_v18, %v2596_v54 }
 0x3b9   : > { %v4102_v52 = vpop.eup %4101  ;;  %3092 = vst [vmem:[%s4863_s25 + $0x158] sm:$0xff] %v4100_v55 }
 0x3ba   : > { %v4104_v60 = vpop.eup %4103  ;;  %4113 = vrcp.f32 %v2904_v56  ;;  %v2903_v61 = vadd.f32 1.0, %v4102_v52  ;;  %v3234_v53 = vmul.f32 -1.442695, %v2597_v59 }
 0x3bb   : > { %3091 = vst [vmem:[%s4863_s25 + $0x150] sm:$0xff] %v4104_v60  ;;  %4115 = vpow2.f32 %v3235_v58 }
 0x3bc   : > { %4117 = vrcp.f32 %v2903_v61 }
 0x3bd   : > { %4119 = vpow2.f32 %v3234_v53  ;;  %v3858_v0 = vpop.f32.mrf.mxu0 }
 0x3be   : > { %v2612_v1 = vadd.f32 %v3858_v0, %v4839_v18 }
 0x3bf   : > { %v4106_v3 = vpop.eup %4105  ;;  %v2606_v4 = vpop.f32.mrf.mxu0 }
 0x3c0   : > { %v4108_v6 = vpop.eup %4107  ;;  %v2906_v7 = vadd.f32 1.0, %v4106_v3  ;;  %v3237_v8 = vmul.f32 -1.442695, %v2612_v1  ;;  %v2607_v63 = vadd.f32 %v4839_v18, %v2606_v4 }
 0x3c1   : > { %v4110_v57 = vpop.eup %4109  ;;  %3094 = vst [vmem:[%s4863_s25 + $0x168] sm:$0xff] %v4108_v6 }
 0x3c2   : > { %v4112_v10 = vpop.eup %4111  ;;  %4121 = vrcp.f32 %v2906_v7  ;;  %v2905_v11 = vadd.f32 1.0, %v4110_v57  ;;  %v3236_v12 = vmul.f32 -1.442695, %v2607_v63 }
 0x3c3   : > { %3093 = vst [vmem:[%s4863_s25 + $0x160] sm:$0xff] %v4112_v10  ;;  %4123 = vpow2.f32 %v3237_v8 }
 0x3c4   : > { %4125 = vrcp.f32 %v2905_v11 }
 0x3c5   : > { %4127 = vpow2.f32 %v3236_v12  ;;  %v3861_v13 = vpop.f32.mrf.mxu0 }
 0x3c6   : > { %v2622_v14 = vadd.f32 %v3861_v13, %v4839_v18 }
 0x3c7   : > { %v4114_v17 = vpop.eup %4113  ;;  %v2616_v62 = vpop.f32.mrf.mxu0 }
 0x3c8   : > { %v4116_v9 = vpop.eup %4115  ;;  %3096 = vst [vmem:[%s4863_s25 + $0x178] sm:$0xff] %v4114_v17  ;;  %v3239_v5 = vmul.f32 -1.442695, %v2622_v14  ;;  %v2617_v19 = vadd.f32 %v4839_v18, %v2616_v62 }
 0x3c9   : > { %v4118_v21 = vpop.eup %4117  ;;  %v2908_v22 = vadd.f32 1.0, %v4116_v9 }
 0x3ca   : > { %v4120_v23 = vpop.eup %4119  ;;  %3095 = vst [vmem:[%s4863_s25 + $0x170] sm:$0xff] %v4118_v21  ;;  %4129 = vpow2.f32 %v3239_v5  ;;  %v3238_v2 = vmul.f32 -1.442695, %v2617_v19 }
 0x3cb   : > { %4131 = vrcp.f32 %v2908_v22  ;;  %v2907_v24 = vadd.f32 1.0, %v4120_v23 }
 0x3cc   : > { %4133 = vpow2.f32 %v3238_v2 }
 0x3cd   : > { %4135 = vrcp.f32 %v2907_v24  ;;  %v3864_v25 = vpop.f32.mrf.mxu0 }
 0x3ce   : > { %v2632_v20 = vadd.f32 %v3864_v25, %v4839_v18 }
 0x3cf   : > { %v4122_v26 = vpop.eup %4121  ;;  %v2626_v27 = vpop.f32.mrf.mxu0 }
 0x3d0   : > { %v4124_v28 = vpop.eup %4123  ;;  %3098 = vst [vmem:[%s4863_s25 + $0x188] sm:$0xff] %v4122_v26  ;;  %v3241_v16 = vmul.f32 -1.442695, %v2632_v20  ;;  %v2627_v29 = vadd.f32 %v4839_v18, %v2626_v27 }
 0x3d1   : > { %v4126_v30 = vpop.eup %4125  ;;  %v2910_v31 = vadd.f32 1.0, %v4124_v28 }
 0x3d2   : > { %v4128_v32 = vpop.eup %4127  ;;  %3097 = vst [vmem:[%s4863_s25 + $0x180] sm:$0xff] %v4126_v30  ;;  %4137 = vpow2.f32 %v3241_v16  ;;  %v3240_v33 = vmul.f32 -1.442695, %v2627_v29 }
 0x3d3   : > { %4139 = vrcp.f32 %v2910_v31  ;;  %v2909_v34 = vadd.f32 1.0, %v4128_v32 }
 0x3d4   : > { %4141 = vpow2.f32 %v3240_v33 }
 0x3d5   : > { %4143 = vrcp.f32 %v2909_v34  ;;  %v3867_v35 = vpop.f32.mrf.mxu0 }
 0x3d6   : > { %v2642_v15 = vadd.f32 %v3867_v35, %v4839_v18 }
 0x3d7   : > { %v4130_v36 = vpop.eup %4129  ;;  %v2636_v37 = vpop.f32.mrf.mxu0 }
 0x3d8   : > { %v4132_v38 = vpop.eup %4131  ;;  %v2912_v39 = vadd.f32 1.0, %v4130_v36  ;;  %v3243_v40 = vmul.f32 -1.442695, %v2642_v15  ;;  %v2637_v41 = vadd.f32 %v4839_v18, %v2636_v37 }
 0x3d9   : > { %v4134_v42 = vpop.eup %4133  ;;  %3100 = vst [vmem:[%s4863_s25 + $0x198] sm:$0xff] %v4132_v38 }
 0x3da   : > { %v4136_v43 = vpop.eup %4135  ;;  %4145 = vrcp.f32 %v2912_v39  ;;  %v2911_v44 = vadd.f32 1.0, %v4134_v42  ;;  %v3242_v45 = vmul.f32 -1.442695, %v2637_v41 }
 0x3db   : > { %3099 = vst [vmem:[%s4863_s25 + $0x190] sm:$0xff] %v4136_v43  ;;  %4147 = vpow2.f32 %v3243_v40 }
 0x3dc   : > { %4149 = vrcp.f32 %v2911_v44 }
 0x3dd   : > { %4151 = vpow2.f32 %v3242_v45  ;;  %v3870_v46 = vpop.f32.mrf.mxu0 }
 0x3de   : > { %v2652_v48 = vadd.f32 %v4180_v47, %v3870_v46 }
 0x3df   : > { %v4138_v49 = vpop.eup %4137  ;;  %v2646_v18 = vpop.f32.mrf.mxu0 }
 0x3e0   : > { %v4140_v50 = vpop.eup %4139  ;;  %v2914_v51 = vadd.f32 1.0, %v4138_v49  ;;  %v3245_v54 = vmul.f32 -1.442695, %v2652_v48  ;;  %v2647_v55 = vadd.f32 %v4180_v47, %v2646_v18 }
 0x3e1   : > { %v4142_v56 = vpop.eup %4141  ;;  %3102 = vst [vmem:[%s4863_s25 + $0x1a8] sm:$0xff] %v4140_v50 }
 0x3e2   : > { %v4144_v58 = vpop.eup %4143  ;;  %4153 = vrcp.f32 %v2914_v51  ;;  %v2913_v59 = vadd.f32 1.0, %v4142_v56  ;;  %v3244_v52 = vmul.f32 -1.442695, %v2647_v55 }
 0x3e3   : > { %3101 = vst [vmem:[%s4863_s25 + $0x1a0] sm:$0xff] %v4144_v58  ;;  %4155 = vpow2.f32 %v3245_v54 }
 0x3e4   : > { %4157 = vrcp.f32 %v2913_v59 }
 0x3e5   : > { %4159 = vpow2.f32 %v3244_v52  ;;  %v3873_v60 = vpop.f32.mrf.mxu0 }
 0x3e6   : > { %v2662_v61 = vadd.f32 %v4180_v47, %v3873_v60 }
 0x3e7   : > { %v4146_v53 = vpop.eup %4145  ;;  %v2656_v0 = vpop.f32.mrf.mxu0 }
 0x3e8   : > { %v4148_v1 = vpop.eup %4147  ;;  %3104 = vst [vmem:[%s4863_s25 + $0x1b8] sm:$0xff] %v4146_v53  ;;  %v3247_v3 = vmul.f32 -1.442695, %v2662_v61  ;;  %v2657_v4 = vadd.f32 %v4180_v47, %v2656_v0 }
 0x3e9   : > { %v4150_v6 = vpop.eup %4149  ;;  %v2916_v7 = vadd.f32 1.0, %v4148_v1 }
 0x3ea   : > { %v4152_v8 = vpop.eup %4151  ;;  %3103 = vst [vmem:[%s4863_s25 + $0x1b0] sm:$0xff] %v4150_v6  ;;  %4161 = vpow2.f32 %v3247_v3  ;;  %v3246_v63 = vmul.f32 -1.442695, %v2657_v4 }
 0x3eb   : > { %4163 = vrcp.f32 %v2916_v7  ;;  %v2915_v57 = vadd.f32 1.0, %v4152_v8 }
 0x3ec   : > { %4165 = vpow2.f32 %v3246_v63 }
 0x3ed   : > { %4167 = vrcp.f32 %v2915_v57 }
 0x3ef   : > { %v4154_v10 = vpop.eup %4153 }
 0x3f0   : > { %v4156_v11 = vpop.eup %4155  ;;  %3106 = vst [vmem:[%s4863_s25 + $0x1c8] sm:$0xff] %v4154_v10 }
 0x3f1   : > { %v4158_v12 = vpop.eup %4157  ;;  %v2918_v13 = vadd.f32 1.0, %v4156_v11 }
 0x3f2   : > { %v4160_v14 = vpop.eup %4159  ;;  %3105 = vst [vmem:[%s4863_s25 + $0x1c0] sm:$0xff] %v4158_v12 }
 0x3f3   : > { %4169 = vrcp.f32 %v2918_v13  ;;  %v2917_v17 = vadd.f32 1.0, %v4160_v14 }
 0x3f5   : > { %4171 = vrcp.f32 %v2917_v17 }
 0x3f7   : > { %v4162_v62 = vpop.eup %4161 }
 0x3f8   : > { %v4164_v9 = vpop.eup %4163  ;;  %v2920_v5 = vadd.f32 1.0, %v4162_v62 }
 0x3f9   : > { %v4166_v19 = vpop.eup %4165  ;;  %3108 = vst [vmem:[%s4863_s25 + $0x1d8] sm:$0xff] %v4164_v9 }
 0x3fa   : > { %v4168_v21 = vpop.eup %4167  ;;  %4173 = vrcp.f32 %v2920_v5  ;;  %v2919_v22 = vadd.f32 1.0, %v4166_v19 }
 0x3fb   : > { %3107 = vst [vmem:[%s4863_s25 + $0x1d0] sm:$0xff] %v4168_v21 }
 0x3fc   : > { %4175 = vrcp.f32 %v2919_v22 }
 0x400   : > { %v4170_v23 = vpop.eup %4169 }
 0x401   : > { %3110 = vst [vmem:[%s4863_s25 + $0x1e8] sm:$0xff] %v4170_v23 }
 0x402   : > { %v4172_v2 = vpop.eup %4171 }
 0x403   : > { %3109 = vst [vmem:[%s4863_s25 + $0x1e0] sm:$0xff] %v4172_v2 }
 0x407   : > { %v4174_v24 = vpop.eup %4173 }
 0x408   : > { %3112 = vst [vmem:[%s4863_s25 + $0x1f8] sm:$0xff] %v4174_v24 }
 0x409   : > { %v4176_v25 = vpop.eup %4175 }
 0x40a   : > { %3111 = vst [vmem:[%s4863_s25 + $0x1f0] sm:$0xff] %v4176_v25 }
 0x40b PF: > { %s19_s30 = sadd.s32 1, %s4187_s30  }
 0x40c   : > { %p16_p4 = scmp.ge.s32.totalorder %s19_s30, 4  }
 0x40e   :  { %18 = sbr.rel (!%p16_p4) target bundleno = 1 (0x1), region = 86 }

</bundles_post_ra>
